<compile_context>
chip_gen: v6e
topology: v6e:2x2x1
jax: 0.10.0
libtpu: 0.0.40
codegen_flags: <defaults>
</compile_context>

<pallas_src>
import math
import functools

import jax
import jax.numpy as jnp
from jax.experimental import pallas as pl
from jax.experimental.pallas import tpu as pltpu

MODEL_DIM = 64
STATE_DIM = 128
STAGES = 20
IN_DIM = 2048
NUM_CLASSES = 202
CLS_PAD = 256          # lane-dense classifier output width (sliced to 202 outside)
GLU_PAD = 128          # each GLU half padded to a full 128-lane vreg
LN_EPS = 1e-5
VMEM_LIMIT = 32 * 1024 * 1024   # explicit scoped-VMEM budget (safe on v5e/v6e/v7x)


# ---------------------------------------------------------------------------
# Kernel 1: fused LayerNorm(2048) + embedding Linear(2048 -> 64), row-tiled
# ---------------------------------------------------------------------------
def embed_kernel(x_ref, g_ref, b_ref, w_ref, wb_ref, o_ref):
    x = x_ref[...]                                          # (rt, 2048) f32
    mu = jnp.mean(x, axis=-1, keepdims=True)
    var = jnp.mean((x - mu) ** 2, axis=-1, keepdims=True)
    xn = (x - mu) * jax.lax.rsqrt(var + LN_EPS) * g_ref[...] + b_ref[...]
    o_ref[...] = (
        jnp.dot(xn.astype(jnp.bfloat16), w_ref[...],
                preferred_element_type=jnp.float32)
        + wb_ref[...]
    )


def embed_call(x2d, ln_g, ln_b, w_bf16, b):
    rows = x2d.shape[0]
    row_tile = rows if rows <= 512 else 512
    grid = (pl.cdiv(rows, row_tile),)
    return pl.pallas_call(
        embed_kernel,
        out_shape=jax.ShapeDtypeStruct((rows, MODEL_DIM), jnp.float32),
        grid=grid,
        in_specs=[
            pl.BlockSpec((row_tile, IN_DIM), lambda i: (i, 0)),
            pl.BlockSpec((1, IN_DIM), lambda i: (0, 0)),
            pl.BlockSpec((1, IN_DIM), lambda i: (0, 0)),
            pl.BlockSpec((IN_DIM, MODEL_DIM), lambda i: (0, 0)),
            pl.BlockSpec((1, MODEL_DIM), lambda i: (0, 0)),
        ],
        out_specs=pl.BlockSpec((row_tile, MODEL_DIM), lambda i: (i, 0)),
        compiler_params=pltpu.CompilerParams(
            dimension_semantics=("parallel",),
            vmem_limit_bytes=VMEM_LIMIT),
    )(x2d, ln_g, ln_b, w_bf16, b)


# ---------------------------------------------------------------------------
# Kernel 2: all 20 LRU residual blocks in one invocation.
#
# Layout: activations are (rows, D) with rows = B_tile * T, time fastest, so
# time sits on the sublane axis. Per layer:
#   h   = LayerNorm(x)
#   u   = h @ [gamma*B_re | gamma*B_im]                 (one (64,256) matmul)
#   s_t = lambda * s_{t-1} + u_t                        (segmented Hillis-Steele
#                                                        scan over the row axis)
#   y   = s_re @ C_re^T - s_im @ C_im^T + D*h
#   out = x + glu( gelu(y) @ [W1|W2] + [b1|b2] )        (halves padded to 128 lanes)
# ---------------------------------------------------------------------------
def lru_stack_kernel(x_ref, lng_ref, lnb_ref, lre_ref, lim_ref,
                     bg_ref, cre_ref, cimn_ref, dvec_ref, w12_ref, b12_ref,
                     o_ref, *, seq_len):
    R, D = x_ref.shape
    N = lre_ref.shape[-1]
    L = lng_ref.shape[0]
    DP = w12_ref.shape[-1] // 2

    # Per-row time index (rows are sequence-major, time-minor). Precompute the
    # shift masks once; they are shared by all layers (hoisted out of the loop).
    bt = R // seq_len
    t_idx = jax.lax.broadcasted_iota(
        jnp.int32, (bt, seq_len, N), 1).reshape(R, N)
    shift_masks = []
    d = 1
    while d < seq_len:
        shift_masks.append((d, t_idx >= d))
        d *= 2

    def layer_body(l, x):
        ln_g = lng_ref[l]                                   # (1, D)
        ln_b = lnb_ref[l]
        lam_re = lre_ref[l]                                 # (1, N)
        lam_im = lim_ref[l]
        bg = bg_ref[l]                                      # (D, 2N) bf16
        c_re = cre_ref[l]                                   # (N, D) bf16
        c_imn = cimn_ref[l]                                 # (N, D) bf16 (= -C_im^T)
        dvec = dvec_ref[l]                                  # (1, D)
        w12 = w12_ref[l]                                    # (D, 2*DP) bf16
        b12 = b12_ref[l]                                    # (1, 2*DP)

        # LayerNorm over the model dim.
        mu = jnp.mean(x, axis=-1, keepdims=True)
        var = jnp.mean((x - mu) ** 2, axis=-1, keepdims=True)
        h = (x - mu) * jax.lax.rsqrt(var + LN_EPS) * ln_g + ln_b

        # Fused complex input projection (gamma folded into B): (R,64)@(64,256).
        u = jnp.dot(h.astype(jnp.bfloat16), bg,
                    preferred_element_type=jnp.float32)     # (R, 2N)
        b_re = u[:, :N]                                     # lane-boundary views
        b_im = u[:, N:]
        a_re = jnp.broadcast_to(lam_re, (R, N))
        a_im = jnp.broadcast_to(lam_im, (R, N))

        # Segmented Hillis-Steele scan over the row (time) axis:
        # sublane roll on the XLU + mask-select; no concatenates.
        for dd, mask in shift_masks:
            pa_re = jnp.where(mask, pltpu.roll(a_re, shift=dd, axis=0), 1.0)
            pa_im = jnp.where(mask, pltpu.roll(a_im, shift=dd, axis=0), 0.0)
            pb_re = jnp.where(mask, pltpu.roll(b_re, shift=dd, axis=0), 0.0)
            pb_im = jnp.where(mask, pltpu.roll(b_im, shift=dd, axis=0), 0.0)
            nb_re = a_re * pb_re - a_im * pb_im + b_re
            nb_im = a_re * pb_im + a_im * pb_re + b_im
            na_re = a_re * pa_re - a_im * pa_im
            na_im = a_re * pa_im + a_im * pa_re
            a_re, a_im, b_re, b_im = na_re, na_im, nb_re, nb_im

        # Output projection Re(C s) = s_re @ C_re^T - s_im @ C_im^T (no concat).
        y = (jnp.dot(b_re.astype(jnp.bfloat16), c_re,
                     preferred_element_type=jnp.float32)
             + jnp.dot(b_im.astype(jnp.bfloat16), c_imn,
                       preferred_element_type=jnp.float32))
        y = y + dvec * h

        # GLU output block; value/gate halves sit on vreg boundaries (DP=128).
        g = jax.nn.gelu(y, approximate=True)
        gw = jnp.dot(g.astype(jnp.bfloat16), w12,
                     preferred_element_type=jnp.float32) + b12   # (R, 2*DP)
        glu = gw[:, :DP] * jax.nn.sigmoid(gw[:, DP:])
        return x + glu[:, :D]

    o_ref[...] = jax.lax.fori_loop(0, L, layer_body, x_ref[...])


def lru_stack_call(h2d, sp, seq_len):
    rows, D = h2d.shape
    N = STATE_DIM
    L = STAGES
    batch = rows // seq_len

    # Split the batch across 2 tiles when the tile stays sublane-aligned
    # (v7x megacore; near-free on single-core v5e/v6e since weights keep a
    # constant block index and are not re-fetched).
    n_tiles = 1
    if batch % 2 == 0 and batch >= 2 and ((batch // 2) * seq_len) % 8 == 0:
        n_tiles = 2
    row_tile = rows // n_tiles

    const3 = lambda i: (0, 0, 0)
    kern = functools.partial(lru_stack_kernel, seq_len=seq_len)
    return pl.pallas_call(
        kern,
        out_shape=jax.ShapeDtypeStruct((rows, D), jnp.float32),
        grid=(n_tiles,),
        in_specs=[
            pl.BlockSpec((row_tile, D), lambda i: (i, 0)),   # activations
            pl.BlockSpec((L, 1, D), const3),                 # ln_g
            pl.BlockSpec((L, 1, D), const3),                 # ln_b
            pl.BlockSpec((L, 1, N), const3),                 # lam_re
            pl.BlockSpec((L, 1, N), const3),                 # lam_im
            pl.BlockSpec((L, D, 2 * N), const3),             # [gB_re | gB_im] (bf16)
            pl.BlockSpec((L, N, D), const3),                 # C_re^T (bf16)
            pl.BlockSpec((L, N, D), const3),                 # -C_im^T (bf16)
            pl.BlockSpec((L, 1, D), const3),                 # D skip
            pl.BlockSpec((L, D, 2 * GLU_PAD), const3),       # [W1 | W2] padded (bf16)
            pl.BlockSpec((L, 1, 2 * GLU_PAD), const3),       # [b1 | b2] padded
        ],
        out_specs=pl.BlockSpec((row_tile, D), lambda i: (i, 0)),
        compiler_params=pltpu.CompilerParams(
            dimension_semantics=("parallel",),
            vmem_limit_bytes=VMEM_LIMIT),
    )(h2d, sp["ln_g"], sp["ln_b"], sp["lam_re"], sp["lam_im"],
      sp["Bg_cat"], sp["C_reT"], sp["C_imT_neg"], sp["D"],
      sp["W12"], sp["b12"])


# ---------------------------------------------------------------------------
# Kernel 3: classifier Linear(64 -> 202), lane-dense padded output (256)
# ---------------------------------------------------------------------------
def classifier_kernel(x_ref, w_ref, b_ref, o_ref):
    o_ref[...] = (
        jnp.dot(x_ref[...].astype(jnp.bfloat16), w_ref[...],
                preferred_element_type=jnp.float32)
        + b_ref[...]
    )


def classifier_call(x2d, w_pad, b_pad):
    rows = x2d.shape[0]
    row_tile = rows if rows <= 512 else 512
    grid = (pl.cdiv(rows, row_tile),)
    return pl.pallas_call(
        classifier_kernel,
        out_shape=jax.ShapeDtypeStruct((rows, CLS_PAD), jnp.float32),
        grid=grid,
        in_specs=[
            pl.BlockSpec((row_tile, MODEL_DIM), lambda i: (i, 0)),
            pl.BlockSpec((MODEL_DIM, CLS_PAD), lambda i: (0, 0)),
            pl.BlockSpec((1, CLS_PAD), lambda i: (0, 0)),
        ],
        out_specs=pl.BlockSpec((row_tile, CLS_PAD), lambda i: (i, 0)),
        compiler_params=pltpu.CompilerParams(
            dimension_semantics=("parallel",),
            vmem_limit_bytes=VMEM_LIMIT),
    )(x2d, w_pad, b_pad)


# ---------------------------------------------------------------------------
# Parameter init (deterministic, synthetic)
# ---------------------------------------------------------------------------
def init_lru_layer_params(key, d_model, d_state, phase_max):
    ks = jax.random.split(key, 8)
    r_min, r_max = 0.0, 1.0
    u1 = jax.random.uniform(ks[0], (d_state,), minval=1e-4, maxval=1.0)
    u2 = jax.random.uniform(ks[1], (d_state,), minval=0.0, maxval=1.0)
    nu = -0.5 * jnp.log(u1 * (r_max ** 2 - r_min ** 2) + r_min ** 2)
    theta = phase_max * u2
    lam_mod = jnp.exp(-nu)
    lam_re = lam_mod * jnp.cos(theta)
    lam_im = lam_mod * jnp.sin(theta)
    gamma = jnp.sqrt(jnp.maximum(1.0 - lam_mod ** 2, 1e-8))

    B_re = jax.random.normal(ks[2], (d_state, d_model)) / math.sqrt(2 * d_model)
    B_im = jax.random.normal(ks[3], (d_state, d_model)) / math.sqrt(2 * d_model)
    C_re = jax.random.normal(ks[4], (d_model, d_state)) / math.sqrt(d_state)
    C_im = jax.random.normal(ks[5], (d_model, d_state)) / math.sqrt(d_state)
    D_vec = jax.random.normal(ks[6], (d_model,))
    W1 = jax.random.normal(ks[7], (d_model, d_model)) / math.sqrt(d_model)
    W2 = (jax.random.normal(jax.random.fold_in(key, 99), (d_model, d_model))
          / math.sqrt(d_model))

    f32, bf16 = jnp.float32, jnp.bfloat16
    Bg_re = (B_re * gamma[:, None]).T                        # (D, N)
    Bg_im = (B_im * gamma[:, None]).T                        # (D, N)

    # GLU halves padded to full 128-lane vregs: W1 -> cols [0:64], W2 -> [128:192].
    W12 = jnp.zeros((d_model, 2 * GLU_PAD), f32)
    W12 = W12.at[:, :d_model].set(W1).at[:, GLU_PAD:GLU_PAD + d_model].set(W2)

    return {
        "ln_g": jnp.ones((1, d_model), f32),
        "ln_b": jnp.zeros((1, d_model), f32),
        "lam_re": lam_re.reshape(1, d_state).astype(f32),
        "lam_im": lam_im.reshape(1, d_state).astype(f32),
        # fused input projection (gamma folded into B): (D, 2N)
        "Bg_cat": jnp.concatenate([Bg_re, Bg_im], axis=1).astype(bf16),
        # output projection factors (N, D)
        "C_reT": C_re.T.astype(bf16),
        "C_imT_neg": (-C_im.T).astype(bf16),
        "D": D_vec.reshape(1, d_model).astype(f32),
        "W12": W12.astype(bf16),                              # (D, 2*GLU_PAD)
        "b12": jnp.zeros((1, 2 * GLU_PAD), f32),
    }


def init_params(key):
    f32, bf16 = jnp.float32, jnp.bfloat16
    keys = jax.random.split(key, STAGES + 3)

    layer_list = [
        init_lru_layer_params(keys[2 + s], MODEL_DIM, STATE_DIM, math.pi / 50)
        for s in range(STAGES)
    ]
    stack = {k: jnp.stack([lp[k] for lp in layer_list], axis=0)
             for k in layer_list[0]}

    cls_w = (jax.random.normal(keys[1], (MODEL_DIM, NUM_CLASSES))
             / math.sqrt(MODEL_DIM)).astype(f32)
    cls_w_pad = jnp.zeros((MODEL_DIM, CLS_PAD), f32).at[:, :NUM_CLASSES].set(cls_w)

    return {
        "norm_g": jnp.ones((1, IN_DIM), f32),
        "norm_b": jnp.zeros((1, IN_DIM), f32),
        "embed_w": (jax.random.normal(keys[0], (IN_DIM, MODEL_DIM))
                    / math.sqrt(IN_DIM)).astype(bf16),
        "embed_b": jnp.zeros((1, MODEL_DIM), f32),
        "cls_w": cls_w_pad.astype(bf16),
        "cls_b": jnp.zeros((1, CLS_PAD), f32),
        "stack": stack,
    }


# ---------------------------------------------------------------------------
# Forward pass (no activation transposes: everything stays (B*T, feat))
# ---------------------------------------------------------------------------
@jax.jit
def forward(params, x):
    # x: (B, T, 2048) float32
    B, T, Din = x.shape
    x2 = x.reshape(B * T, Din)
    h = embed_call(x2, params["norm_g"], params["norm_b"],
                   params["embed_w"], params["embed_b"])            # (B*T, 64)
    h = lru_stack_call(h, params["stack"], T)                       # (B*T, 64)
    logits = classifier_call(h, params["cls_w"], params["cls_b"])   # (B*T, 256)
    logits = logits[:, :NUM_CLASSES].reshape(B, T, NUM_CLASSES)     # (B, T, 202)
    return logits[None, ...]                                        # (1, B, T, 202)


if __name__ == "__main__":
    key = jax.random.PRNGKey(0)
    pkey, xkey = jax.random.split(key)
    params = init_params(pkey)

    B, T = 2, 8
    x = jax.random.normal(xkey, (B, T, IN_DIM), dtype=jnp.float32)

    out = forward(params, x)
    out = jax.block_until_ready(out)
    assert out.shape == (1, B, T, NUM_CLASSES), out.shape
    assert jnp.all(jnp.isfinite(out))
    print("KERNEL_OK")
</pallas_src>

<mosaic_0001>
module attributes {stable_mosaic.version = 11 : i64} {
  func.func @embed_kernel(%arg0: i32, %arg1: memref<16x2048xf32, #tpu.memory_space<vmem>>, %arg2: memref<1x2048xf32, #tpu.memory_space<vmem>>, %arg3: memref<1x2048xf32, #tpu.memory_space<vmem>>, %arg4: memref<2048x64xbf16, #tpu.memory_space<vmem>>, %arg5: memref<1x64xf32, #tpu.memory_space<vmem>>, %arg6: memref<16x64xf32, #tpu.memory_space<vmem>>) attributes {dimension_semantics = [#tpu.dimension_semantics<parallel>], iteration_bounds = array<i64: 1>, scalar_prefetch = 0 : i64, scratch_operands = 0 : i64, tpu.core_type = #tpu.core_type<tc>, window_params = [{transform_indices = @transform_0, window_bounds = array<i64: 16, 2048>}, {pipeline_mode = #tpu.pipeline_mode<synchronous>, transform_indices = @transform_1, window_bounds = array<i64: 1, 2048>}, {pipeline_mode = #tpu.pipeline_mode<synchronous>, transform_indices = @transform_2, window_bounds = array<i64: 1, 2048>}, {pipeline_mode = #tpu.pipeline_mode<synchronous>, transform_indices = @transform_3, window_bounds = array<i64: 2048, 64>}, {pipeline_mode = #tpu.pipeline_mode<synchronous>, transform_indices = @transform_4, window_bounds = array<i64: 1, 64>}, {transform_indices = @transform_5, window_bounds = array<i64: 16, 64>}]} {
    %c0 = arith.constant 0 : index
    %c0_0 = arith.constant 0 : index
    %0 = vector.load %arg1[%c0, %c0_0] : memref<16x2048xf32, #tpu.memory_space<vmem>>, vector<16x2048xf32>
    %cst = arith.constant dense<0.000000e+00> : vector<16xf32>
    %1 = vector.multi_reduction <add>, %0, %cst [1] : vector<16x2048xf32> to vector<16xf32>
    %2 = vector.shape_cast %1 : vector<16xf32> to vector<16x1xf32>
    %cst_1 = arith.constant 2.048000e+03 : f32
    %3 = vector.broadcast %cst_1 : f32 to vector<16x1xf32>
    %4 = arith.divf %2, %3 : vector<16x1xf32>
    %5 = vector.broadcast %4 : vector<16x1xf32> to vector<16x2048xf32>
    %6 = arith.subf %0, %5 : vector<16x2048xf32>
    %7 = arith.mulf %6, %6 : vector<16x2048xf32>
    %cst_2 = arith.constant dense<0.000000e+00> : vector<16xf32>
    %8 = vector.multi_reduction <add>, %7, %cst_2 [1] : vector<16x2048xf32> to vector<16xf32>
    %9 = vector.shape_cast %8 : vector<16xf32> to vector<16x1xf32>
    %cst_3 = arith.constant 2.048000e+03 : f32
    %10 = vector.broadcast %cst_3 : f32 to vector<16x1xf32>
    %11 = arith.divf %9, %10 : vector<16x1xf32>
    %12 = vector.broadcast %4 : vector<16x1xf32> to vector<16x2048xf32>
    %13 = arith.subf %0, %12 : vector<16x2048xf32>
    %cst_4 = arith.constant 9.99999974E-6 : f32
    %14 = vector.broadcast %cst_4 : f32 to vector<16x1xf32>
    %15 = arith.addf %11, %14 : vector<16x1xf32>
    %16 = math.rsqrt %15 : vector<16x1xf32>
    %17 = vector.broadcast %16 : vector<16x1xf32> to vector<16x2048xf32>
    %18 = arith.mulf %13, %17 : vector<16x2048xf32>
    %c0_5 = arith.constant 0 : index
    %c0_6 = arith.constant 0 : index
    %19 = vector.load %arg2[%c0_5, %c0_6] : memref<1x2048xf32, #tpu.memory_space<vmem>>, vector<1x2048xf32>
    %20 = vector.broadcast %19 : vector<1x2048xf32> to vector<16x2048xf32>
    %21 = arith.mulf %18, %20 : vector<16x2048xf32>
    %c0_7 = arith.constant 0 : index
    %c0_8 = arith.constant 0 : index
    %22 = vector.load %arg3[%c0_7, %c0_8] : memref<1x2048xf32, #tpu.memory_space<vmem>>, vector<1x2048xf32>
    %23 = vector.broadcast %22 : vector<1x2048xf32> to vector<16x2048xf32>
    %24 = arith.addf %21, %23 : vector<16x2048xf32>
    %25 = arith.truncf %24 : vector<16x2048xf32> to vector<16x2048xbf16>
    %c0_9 = arith.constant 0 : index
    %c0_10 = arith.constant 0 : index
    %26 = vector.load %arg4[%c0_9, %c0_10] : memref<2048x64xbf16, #tpu.memory_space<vmem>>, vector<2048x64xbf16>
    %cst_11 = arith.constant dense<0.000000e+00> : vector<16x64xf32>
    %27 = tpu.matmul %25, %26, %cst_11 {dimension_numbers = #tpu.dot_dimension_numbers<[1], [0], [0], [1], [0, 0, 1, 1], [], []>} : vector<16x2048xbf16>, vector<2048x64xbf16>, vector<16x64xf32> -> vector<16x64xf32>
    %c0_12 = arith.constant 0 : index
    %c0_13 = arith.constant 0 : index
    %28 = vector.load %arg5[%c0_12, %c0_13] : memref<1x64xf32, #tpu.memory_space<vmem>>, vector<1x64xf32>
    %29 = vector.broadcast %28 : vector<1x64xf32> to vector<16x64xf32>
    %30 = arith.addf %27, %29 : vector<16x64xf32>
    %c0_14 = arith.constant 0 : index
    %c0_15 = arith.constant 0 : index
    %31 = vector.load %arg6[%c0_14, %c0_15] : memref<16x64xf32, #tpu.memory_space<vmem>>, vector<16x64xf32>
    tpu.vector_store %arg6[%c0_14, %c0_15], %30 {strides = array<i32>} : memref<16x64xf32, #tpu.memory_space<vmem>>, vector<16x64xf32>,
    return
  }
  func.func @transform_0(%arg0: i32) -> (i32, i32) {
    %c0_i32 = arith.constant 0 : i32
    %c0_i32_0 = arith.constant 0 : i32
    return %arg0, %c0_i32 : i32, i32
  }
  func.func @transform_1(%arg0: i32) -> (i32, i32) {
    %c0_i32 = arith.constant 0 : i32
    %c0_i32_0 = arith.constant 0 : i32
    %c0_i32_1 = arith.constant 0 : i32
    return %c0_i32, %c0_i32_0 : i32, i32
  }
  func.func @transform_2(%arg0: i32) -> (i32, i32) {
    %c0_i32 = arith.constant 0 : i32
    %c0_i32_0 = arith.constant 0 : i32
    %c0_i32_1 = arith.constant 0 : i32
    return %c0_i32, %c0_i32_0 : i32, i32
  }
  func.func @transform_3(%arg0: i32) -> (i32, i32) {
    %c0_i32 = arith.constant 0 : i32
    %c0_i32_0 = arith.constant 0 : i32
    %c0_i32_1 = arith.constant 0 : i32
    return %c0_i32, %c0_i32_0 : i32, i32
  }
  func.func @transform_4(%arg0: i32) -> (i32, i32) {
    %c0_i32 = arith.constant 0 : i32
    %c0_i32_0 = arith.constant 0 : i32
    %c0_i32_1 = arith.constant 0 : i32
    return %c0_i32, %c0_i32_0 : i32, i32
  }
  func.func @transform_5(%arg0: i32) -> (i32, i32) {
    %c0_i32 = arith.constant 0 : i32
    %c0_i32_0 = arith.constant 0 : i32
    return %arg0, %c0_i32 : i32, i32
  }
}

module attributes {stable_mosaic.version = 11 : i64} {
  func.func @lru_stack_kernel(%arg0: i32, %arg1: memref<8x64xf32, #tpu.memory_space<vmem>>, %arg2: memref<20x1x64xf32, #tpu.memory_space<vmem>>, %arg3: memref<20x1x64xf32, #tpu.memory_space<vmem>>, %arg4: memref<20x1x128xf32, #tpu.memory_space<vmem>>, %arg5: memref<20x1x128xf32, #tpu.memory_space<vmem>>, %arg6: memref<20x64x256xbf16, #tpu.memory_space<vmem>>, %arg7: memref<20x128x64xbf16, #tpu.memory_space<vmem>>, %arg8: memref<20x128x64xbf16, #tpu.memory_space<vmem>>, %arg9: memref<20x1x64xf32, #tpu.memory_space<vmem>>, %arg10: memref<20x64x256xbf16, #tpu.memory_space<vmem>>, %arg11: memref<20x1x256xf32, #tpu.memory_space<vmem>>, %arg12: memref<8x64xf32, #tpu.memory_space<vmem>>) attributes {dimension_semantics = [#tpu.dimension_semantics<parallel>], iteration_bounds = array<i64: 2>, scalar_prefetch = 0 : i64, scratch_operands = 0 : i64, tpu.core_type = #tpu.core_type<tc>, window_params = [{transform_indices = @transform_0, window_bounds = array<i64: 8, 64>}, {pipeline_mode = #tpu.pipeline_mode<synchronous>, transform_indices = @transform_1, window_bounds = array<i64: 20, 1, 64>}, {pipeline_mode = #tpu.pipeline_mode<synchronous>, transform_indices = @transform_2, window_bounds = array<i64: 20, 1, 64>}, {pipeline_mode = #tpu.pipeline_mode<synchronous>, transform_indices = @transform_3, window_bounds = array<i64: 20, 1, 128>}, {pipeline_mode = #tpu.pipeline_mode<synchronous>, transform_indices = @transform_4, window_bounds = array<i64: 20, 1, 128>}, {pipeline_mode = #tpu.pipeline_mode<synchronous>, transform_indices = @transform_5, window_bounds = array<i64: 20, 64, 256>}, {pipeline_mode = #tpu.pipeline_mode<synchronous>, transform_indices = @transform_6, window_bounds = array<i64: 20, 128, 64>}, {pipeline_mode = #tpu.pipeline_mode<synchronous>, transform_indices = @transform_7, window_bounds = array<i64: 20, 128, 64>}, {pipeline_mode = #tpu.pipeline_mode<synchronous>, transform_indices = @transform_8, window_bounds = array<i64: 20, 1, 64>}, {pipeline_mode = #tpu.pipeline_mode<synchronous>, transform_indices = @transform_9, window_bounds = array<i64: 20, 64, 256>}, {pipeline_mode = #tpu.pipeline_mode<synchronous>, transform_indices = @transform_10, window_bounds = array<i64: 20, 1, 256>}, {transform_indices = @transform_11, window_bounds = array<i64: 8, 64>}]} {
    %0 = tpu.iota {dimensions = array<i32: 1>} : vector<1x8x128xi32>
    %1 = vector.shape_cast %0 : vector<1x8x128xi32> to vector<8x128xi32>
    %c1_i32 = arith.constant 1 : i32
    %2 = vector.broadcast %c1_i32 : i32 to vector<8x128xi32>
    %3 = arith.cmpi sge, %1, %2 : vector<8x128xi32>
    %c2_i32 = arith.constant 2 : i32
    %4 = vector.broadcast %c2_i32 : i32 to vector<8x128xi32>
    %5 = arith.cmpi sge, %1, %4 : vector<8x128xi32>
    %c4_i32 = arith.constant 4 : i32
    %6 = vector.broadcast %c4_i32 : i32 to vector<8x128xi32>
    %7 = arith.cmpi sge, %1, %6 : vector<8x128xi32>
    %c0 = arith.constant 0 : index
    %c0_0 = arith.constant 0 : index
    %8 = vector.load %arg1[%c0, %c0_0] : memref<8x64xf32, #tpu.memory_space<vmem>>, vector<8x64xf32>
    %c0_i32 = arith.constant 0 : i32
    %c20_i32 = arith.constant 20 : i32
    %9 = arith.addi %c0_i32, %c20_i32 : i32
    %c1_i32_1 = arith.constant 1 : i32
    %10 = scf.for %arg13 = %c0_i32 to %9 step %c1_i32_1 iter_args(%arg14 = %8) -> (vector<8x64xf32>)  : i32 {
      %12 = arith.index_cast %arg13 : i32 to index
      %c0_5 = arith.constant 0 : index
      %c0_6 = arith.constant 0 : index
      %13 = vector.load %arg2[%12, %c0_5, %c0_6] : memref<20x1x64xf32, #tpu.memory_space<vmem>>, vector<1x1x64xf32>
      %14 = vector.shape_cast %13 : vector<1x1x64xf32> to vector<1x64xf32>
      %15 = arith.index_cast %arg13 : i32 to index
      %c0_7 = arith.constant 0 : index
      %c0_8 = arith.constant 0 : index
      %16 = vector.load %arg3[%15, %c0_7, %c0_8] : memref<20x1x64xf32, #tpu.memory_space<vmem>>, vector<1x1x64xf32>
      %17 = vector.shape_cast %16 : vector<1x1x64xf32> to vector<1x64xf32>
      %18 = arith.index_cast %arg13 : i32 to index
      %c0_9 = arith.constant 0 : index
      %c0_10 = arith.constant 0 : index
      %19 = vector.load %arg4[%18, %c0_9, %c0_10] : memref<20x1x128xf32, #tpu.memory_space<vmem>>, vector<1x1x128xf32>
      %20 = vector.shape_cast %19 : vector<1x1x128xf32> to vector<1x128xf32>
      %21 = arith.index_cast %arg13 : i32 to index
      %c0_11 = arith.constant 0 : index
      %c0_12 = arith.constant 0 : index
      %22 = vector.load %arg5[%21, %c0_11, %c0_12] : memref<20x1x128xf32, #tpu.memory_space<vmem>>, vector<1x1x128xf32>
      %23 = vector.shape_cast %22 : vector<1x1x128xf32> to vector<1x128xf32>
      %24 = arith.index_cast %arg13 : i32 to index
      %c0_13 = arith.constant 0 : index
      %c0_14 = arith.constant 0 : index
      %25 = vector.load %arg6[%24, %c0_13, %c0_14] : memref<20x64x256xbf16, #tpu.memory_space<vmem>>, vector<1x64x256xbf16>
      %26 = vector.shape_cast %25 : vector<1x64x256xbf16> to vector<64x256xbf16>
      %27 = arith.index_cast %arg13 : i32 to index
      %c0_15 = arith.constant 0 : index
      %c0_16 = arith.constant 0 : index
      %28 = vector.load %arg7[%27, %c0_15, %c0_16] : memref<20x128x64xbf16, #tpu.memory_space<vmem>>, vector<1x128x64xbf16>
      %29 = vector.shape_cast %28 : vector<1x128x64xbf16> to vector<128x64xbf16>
      %30 = arith.index_cast %arg13 : i32 to index
      %c0_17 = arith.constant 0 : index
      %c0_18 = arith.constant 0 : index
      %31 = vector.load %arg8[%30, %c0_17, %c0_18] : memref<20x128x64xbf16, #tpu.memory_space<vmem>>, vector<1x128x64xbf16>
      %32 = vector.shape_cast %31 : vector<1x128x64xbf16> to vector<128x64xbf16>
      %33 = arith.index_cast %arg13 : i32 to index
      %c0_19 = arith.constant 0 : index
      %c0_20 = arith.constant 0 : index
      %34 = vector.load %arg9[%33, %c0_19, %c0_20] : memref<20x1x64xf32, #tpu.memory_space<vmem>>, vector<1x1x64xf32>
      %35 = vector.shape_cast %34 : vector<1x1x64xf32> to vector<1x64xf32>
      %36 = arith.index_cast %arg13 : i32 to index
      %c0_21 = arith.constant 0 : index
      %c0_22 = arith.constant 0 : index
      %37 = vector.load %arg10[%36, %c0_21, %c0_22] : memref<20x64x256xbf16, #tpu.memory_space<vmem>>, vector<1x64x256xbf16>
      %38 = vector.shape_cast %37 : vector<1x64x256xbf16> to vector<64x256xbf16>
      %39 = arith.index_cast %arg13 : i32 to index
      %c0_23 = arith.constant 0 : index
      %c0_24 = arith.constant 0 : index
      %40 = vector.load %arg11[%39, %c0_23, %c0_24] : memref<20x1x256xf32, #tpu.memory_space<vmem>>, vector<1x1x256xf32>
      %41 = vector.shape_cast %40 : vector<1x1x256xf32> to vector<1x256xf32>
      %cst = arith.constant dense<0.000000e+00> : vector<8xf32>
      %42 = vector.multi_reduction <add>, %arg14, %cst [1] : vector<8x64xf32> to vector<8xf32>
      %43 = vector.shape_cast %42 : vector<8xf32> to vector<8x1xf32>
      %cst_25 = arith.constant 6.400000e+01 : f32
      %44 = vector.broadcast %cst_25 : f32 to vector<8x1xf32>
      %45 = arith.divf %43, %44 : vector<8x1xf32>
      %46 = vector.broadcast %45 : vector<8x1xf32> to vector<8x64xf32>
      %47 = arith.subf %arg14, %46 : vector<8x64xf32>
      %48 = arith.mulf %47, %47 : vector<8x64xf32>
      %cst_26 = arith.constant dense<0.000000e+00> : vector<8xf32>
      %49 = vector.multi_reduction <add>, %48, %cst_26 [1] : vector<8x64xf32> to vector<8xf32>
      %50 = vector.shape_cast %49 : vector<8xf32> to vector<8x1xf32>
      %cst_27 = arith.constant 6.400000e+01 : f32
      %51 = vector.broadcast %cst_27 : f32 to vector<8x1xf32>
      %52 = arith.divf %50, %51 : vector<8x1xf32>
      %53 = vector.broadcast %45 : vector<8x1xf32> to vector<8x64xf32>
      %54 = arith.subf %arg14, %53 : vector<8x64xf32>
      %cst_28 = arith.constant 9.99999974E-6 : f32
      %55 = vector.broadcast %cst_28 : f32 to vector<8x1xf32>
      %56 = arith.addf %52, %55 : vector<8x1xf32>
      %57 = math.rsqrt %56 : vector<8x1xf32>
      %58 = vector.broadcast %57 : vector<8x1xf32> to vector<8x64xf32>
      %59 = arith.mulf %54, %58 : vector<8x64xf32>
      %60 = vector.broadcast %14 : vector<1x64xf32> to vector<8x64xf32>
      %61 = arith.mulf %59, %60 : vector<8x64xf32>
      %62 = vector.broadcast %17 : vector<1x64xf32> to vector<8x64xf32>
      %63 = arith.addf %61, %62 : vector<8x64xf32>
      %64 = arith.truncf %63 : vector<8x64xf32> to vector<8x64xbf16>
      %cst_29 = arith.constant dense<0.000000e+00> : vector<8x256xf32>
      %65 = tpu.matmul %64, %26, %cst_29 {dimension_numbers = #tpu.dot_dimension_numbers<[1], [0], [0], [1], [0, 0, 1, 1], [], []>} : vector<8x64xbf16>, vector<64x256xbf16>, vector<8x256xf32> -> vector<8x256xf32>
      %66 = vector.extract_strided_slice %65 {offsets = [0, 0], sizes = [8, 128], strides = [1, 1]} : vector<8x256xf32> to vector<8x128xf32>
      %67 = vector.extract_strided_slice %65 {offsets = [0, 128], sizes = [8, 128], strides = [1, 1]} : vector<8x256xf32> to vector<8x128xf32>
      %68 = vector.shape_cast %20 : vector<1x128xf32> to vector<1x128xf32>
      %69 = vector.broadcast %68 : vector<1x128xf32> to vector<8x128xf32>
      %70 = vector.shape_cast %23 : vector<1x128xf32> to vector<1x128xf32>
      %71 = vector.broadcast %70 : vector<1x128xf32> to vector<8x128xf32>
      %c1_i32_30 = arith.constant 1 : i32
      %72 = tpu.dynamic_rotate %69 by %c1_i32_30 dim 0 : vector<8x128xf32>, i32 -> vector<8x128xf32>
      %cst_31 = arith.constant 1.000000e+00 : f32
      %73 = vector.broadcast %cst_31 : f32 to vector<8x128xf32>
      %74 = arith.select %3, %72, %73 : vector<8x128xi1>, vector<8x128xf32>
      %c1_i32_32 = arith.constant 1 : i32
      %75 = tpu.dynamic_rotate %71 by %c1_i32_32 dim 0 : vector<8x128xf32>, i32 -> vector<8x128xf32>
      %cst_33 = arith.constant 0.000000e+00 : f32
      %76 = vector.broadcast %cst_33 : f32 to vector<8x128xf32>
      %77 = arith.select %3, %75, %76 : vector<8x128xi1>, vector<8x128xf32>
      %c1_i32_34 = arith.constant 1 : i32
      %78 = tpu.dynamic_rotate %66 by %c1_i32_34 dim 0 : vector<8x128xf32>, i32 -> vector<8x128xf32>
      %cst_35 = arith.constant 0.000000e+00 : f32
      %79 = vector.broadcast %cst_35 : f32 to vector<8x128xf32>
      %80 = arith.select %3, %78, %79 : vector<8x128xi1>, vector<8x128xf32>
      %c1_i32_36 = arith.constant 1 : i32
      %81 = tpu.dynamic_rotate %67 by %c1_i32_36 dim 0 : vector<8x128xf32>, i32 -> vector<8x128xf32>
      %cst_37 = arith.constant 0.000000e+00 : f32
      %82 = vector.broadcast %cst_37 : f32 to vector<8x128xf32>
      %83 = arith.select %3, %81, %82 : vector<8x128xi1>, vector<8x128xf32>
      %84 = arith.mulf %69, %80 : vector<8x128xf32>
      %85 = arith.mulf %71, %83 : vector<8x128xf32>
      %86 = arith.subf %84, %85 : vector<8x128xf32>
      %87 = arith.addf %86, %66 : vector<8x128xf32>
      %88 = arith.mulf %69, %83 : vector<8x128xf32>
      %89 = arith.mulf %71, %80 : vector<8x128xf32>
      %90 = arith.addf %88, %89 : vector<8x128xf32>
      %91 = arith.addf %90, %67 : vector<8x128xf32>
      %92 = arith.mulf %69, %74 : vector<8x128xf32>
      %93 = arith.mulf %71, %77 : vector<8x128xf32>
      %94 = arith.subf %92, %93 : vector<8x128xf32>
      %95 = arith.mulf %69, %77 : vector<8x128xf32>
      %96 = arith.mulf %71, %74 : vector<8x128xf32>
      %97 = arith.addf %95, %96 : vector<8x128xf32>
      %c2_i32_38 = arith.constant 2 : i32
      %98 = tpu.dynamic_rotate %94 by %c2_i32_38 dim 0 : vector<8x128xf32>, i32 -> vector<8x128xf32>
      %cst_39 = arith.constant 1.000000e+00 : f32
      %99 = vector.broadcast %cst_39 : f32 to vector<8x128xf32>
      %100 = arith.select %5, %98, %99 : vector<8x128xi1>, vector<8x128xf32>
      %c2_i32_40 = arith.constant 2 : i32
      %101 = tpu.dynamic_rotate %97 by %c2_i32_40 dim 0 : vector<8x128xf32>, i32 -> vector<8x128xf32>
      %cst_41 = arith.constant 0.000000e+00 : f32
      %102 = vector.broadcast %cst_41 : f32 to vector<8x128xf32>
      %103 = arith.select %5, %101, %102 : vector<8x128xi1>, vector<8x128xf32>
      %c2_i32_42 = arith.constant 2 : i32
      %104 = tpu.dynamic_rotate %87 by %c2_i32_42 dim 0 : vector<8x128xf32>, i32 -> vector<8x128xf32>
      %cst_43 = arith.constant 0.000000e+00 : f32
      %105 = vector.broadcast %cst_43 : f32 to vector<8x128xf32>
      %106 = arith.select %5, %104, %105 : vector<8x128xi1>, vector<8x128xf32>
      %c2_i32_44 = arith.constant 2 : i32
      %107 = tpu.dynamic_rotate %91 by %c2_i32_44 dim 0 : vector<8x128xf32>, i32 -> vector<8x128xf32>
      %cst_45 = arith.constant 0.000000e+00 : f32
      %108 = vector.broadcast %cst_45 : f32 to vector<8x128xf32>
      %109 = arith.select %5, %107, %108 : vector<8x128xi1>, vector<8x128xf32>
      %110 = arith.mulf %94, %106 : vector<8x128xf32>
      %111 = arith.mulf %97, %109 : vector<8x128xf32>
      %112 = arith.subf %110, %111 : vector<8x128xf32>
      %113 = arith.addf %112, %87 : vector<8x128xf32>
      %114 = arith.mulf %94, %109 : vector<8x128xf32>
      %115 = arith.mulf %97, %106 : vector<8x128xf32>
      %116 = arith.addf %114, %115 : vector<8x128xf32>
      %117 = arith.addf %116, %91 : vector<8x128xf32>
      %118 = arith.mulf %94, %100 : vector<8x128xf32>
      %119 = arith.mulf %97, %103 : vector<8x128xf32>
      %120 = arith.subf %118, %119 : vector<8x128xf32>
      %121 = arith.mulf %94, %103 : vector<8x128xf32>
      %122 = arith.mulf %97, %100 : vector<8x128xf32>
      %123 = arith.addf %121, %122 : vector<8x128xf32>
      %c4_i32_46 = arith.constant 4 : i32
      %124 = tpu.dynamic_rotate %113 by %c4_i32_46 dim 0 : vector<8x128xf32>, i32 -> vector<8x128xf32>
      %cst_47 = arith.constant 0.000000e+00 : f32
      %125 = vector.broadcast %cst_47 : f32 to vector<8x128xf32>
      %126 = arith.select %7, %124, %125 : vector<8x128xi1>, vector<8x128xf32>
      %c4_i32_48 = arith.constant 4 : i32
      %127 = tpu.dynamic_rotate %117 by %c4_i32_48 dim 0 : vector<8x128xf32>, i32 -> vector<8x128xf32>
      %cst_49 = arith.constant 0.000000e+00 : f32
      %128 = vector.broadcast %cst_49 : f32 to vector<8x128xf32>
      %129 = arith.select %7, %127, %128 : vector<8x128xi1>, vector<8x128xf32>
      %130 = arith.mulf %120, %126 : vector<8x128xf32>
      %131 = arith.mulf %123, %129 : vector<8x128xf32>
      %132 = arith.subf %130, %131 : vector<8x128xf32>
      %133 = arith.addf %132, %113 : vector<8x128xf32>
      %134 = arith.mulf %120, %129 : vector<8x128xf32>
      %135 = arith.mulf %123, %126 : vector<8x128xf32>
      %136 = arith.addf %134, %135 : vector<8x128xf32>
      %137 = arith.addf %136, %117 : vector<8x128xf32>
      %138 = arith.truncf %133 : vector<8x128xf32> to vector<8x128xbf16>
      %cst_50 = arith.constant dense<0.000000e+00> : vector<8x64xf32>
      %139 = tpu.matmul %138, %29, %cst_50 {dimension_numbers = #tpu.dot_dimension_numbers<[1], [0], [0], [1], [0, 0, 1, 1], [], []>} : vector<8x128xbf16>, vector<128x64xbf16>, vector<8x64xf32> -> vector<8x64xf32>
      %140 = arith.truncf %137 : vector<8x128xf32> to vector<8x128xbf16>
      %cst_51 = arith.constant dense<0.000000e+00> : vector<8x64xf32>
      %141 = tpu.matmul %140, %32, %cst_51 {dimension_numbers = #tpu.dot_dimension_numbers<[1], [0], [0], [1], [0, 0, 1, 1], [], []>} : vector<8x128xbf16>, vector<128x64xbf16>, vector<8x64xf32> -> vector<8x64xf32>
      %142 = arith.addf %139, %141 : vector<8x64xf32>
      %143 = vector.broadcast %35 : vector<1x64xf32> to vector<8x64xf32>
      %144 = arith.mulf %143, %63 : vector<8x64xf32>
      %145 = arith.addf %142, %144 : vector<8x64xf32>
      %146 = arith.mulf %145, %145 : vector<8x64xf32>
      %147 = arith.mulf %145, %146 : vector<8x64xf32>
      %cst_52 = arith.constant 4.471500e-02 : f32
      %148 = vector.broadcast %cst_52 : f32 to vector<8x64xf32>
      %149 = arith.mulf %148, %147 : vector<8x64xf32>
      %150 = arith.addf %145, %149 : vector<8x64xf32>
      %cst_53 = arith.constant 0.797884583 : f32
      %151 = vector.broadcast %cst_53 : f32 to vector<8x64xf32>
      %152 = arith.mulf %151, %150 : vector<8x64xf32>
      %153 = math.tanh %152 : vector<8x64xf32>
      %cst_54 = arith.constant 1.000000e+00 : f32
      %154 = vector.broadcast %cst_54 : f32 to vector<8x64xf32>
      %155 = arith.addf %154, %153 : vector<8x64xf32>
      %cst_55 = arith.constant 5.000000e-01 : f32
      %156 = vector.broadcast %cst_55 : f32 to vector<8x64xf32>
      %157 = arith.mulf %156, %155 : vector<8x64xf32>
      %158 = arith.mulf %145, %157 : vector<8x64xf32>
      %159 = arith.truncf %158 : vector<8x64xf32> to vector<8x64xbf16>
      %cst_56 = arith.constant dense<0.000000e+00> : vector<8x256xf32>
      %160 = tpu.matmul %159, %38, %cst_56 {dimension_numbers = #tpu.dot_dimension_numbers<[1], [0], [0], [1], [0, 0, 1, 1], [], []>} : vector<8x64xbf16>, vector<64x256xbf16>, vector<8x256xf32> -> vector<8x256xf32>
      %161 = vector.broadcast %41 : vector<1x256xf32> to vector<8x256xf32>
      %162 = arith.addf %160, %161 : vector<8x256xf32>
      %163 = vector.extract_strided_slice %162 {offsets = [0, 0], sizes = [8, 128], strides = [1, 1]} : vector<8x256xf32> to vector<8x128xf32>
      %164 = vector.extract_strided_slice %162 {offsets = [0, 128], sizes = [8, 128], strides = [1, 1]} : vector<8x256xf32> to vector<8x128xf32>
      %165 = arith.negf %164 : vector<8x128xf32>
      %166 = math.exp %165 : vector<8x128xf32>
      %cst_57 = arith.constant 1.000000e+00 : f32
      %167 = vector.broadcast %cst_57 : f32 to vector<8x128xf32>
      %168 = arith.addf %167, %166 : vector<8x128xf32>
      %169 = arith.divf %167, %168 : vector<8x128xf32>
      %170 = arith.mulf %163, %169 : vector<8x128xf32>
      %171 = vector.extract_strided_slice %170 {offsets = [0, 0], sizes = [8, 64], strides = [1, 1]} : vector<8x128xf32> to vector<8x64xf32>
      %172 = arith.addf %arg14, %171 : vector<8x64xf32>
      scf.yield %172 : vector<8x64xf32>
    }
    %c20_i32_2 = arith.constant 20 : i32
    %c0_3 = arith.constant 0 : index
    %c0_4 = arith.constant 0 : index
    %11 = vector.load %arg12[%c0_3, %c0_4] : memref<8x64xf32, #tpu.memory_space<vmem>>, vector<8x64xf32>
    tpu.vector_store %arg12[%c0_3, %c0_4], %10 {strides = array<i32>} : memref<8x64xf32, #tpu.memory_space<vmem>>, vector<8x64xf32>,
    return
  }
  func.func @transform_0(%arg0: i32) -> (i32, i32) {
    %c0_i32 = arith.constant 0 : i32
    %c0_i32_0 = arith.constant 0 : i32
    return %arg0, %c0_i32 : i32, i32
  }
  func.func @transform_1(%arg0: i32) -> (i32, i32, i32) {
    %c0_i32 = arith.constant 0 : i32
    %c0_i32_0 = arith.constant 0 : i32
    %c0_i32_1 = arith.constant 0 : i32
    %c0_i32_2 = arith.constant 0 : i32
    return %c0_i32, %c0_i32_0, %c0_i32_1 : i32, i32, i32
  }
  func.func @transform_2(%arg0: i32) -> (i32, i32, i32) {
    %c0_i32 = arith.constant 0 : i32
    %c0_i32_0 = arith.constant 0 : i32
    %c0_i32_1 = arith.constant 0 : i32
    %c0_i32_2 = arith.constant 0 : i32
    return %c0_i32, %c0_i32_0, %c0_i32_1 : i32, i32, i32
  }
  func.func @transform_3(%arg0: i32) -> (i32, i32, i32) {
    %c0_i32 = arith.constant 0 : i32
    %c0_i32_0 = arith.constant 0 : i32
    %c0_i32_1 = arith.constant 0 : i32
    %c0_i32_2 = arith.constant 0 : i32
    return %c0_i32, %c0_i32_0, %c0_i32_1 : i32, i32, i32
  }
  func.func @transform_4(%arg0: i32) -> (i32, i32, i32) {
    %c0_i32 = arith.constant 0 : i32
    %c0_i32_0 = arith.constant 0 : i32
    %c0_i32_1 = arith.constant 0 : i32
    %c0_i32_2 = arith.constant 0 : i32
    return %c0_i32, %c0_i32_0, %c0_i32_1 : i32, i32, i32
  }
  func.func @transform_5(%arg0: i32) -> (i32, i32, i32) {
    %c0_i32 = arith.constant 0 : i32
    %c0_i32_0 = arith.constant 0 : i32
    %c0_i32_1 = arith.constant 0 : i32
    %c0_i32_2 = arith.constant 0 : i32
    return %c0_i32, %c0_i32_0, %c0_i32_1 : i32, i32, i32
  }
  func.func @transform_6(%arg0: i32) -> (i32, i32, i32) {
    %c0_i32 = arith.constant 0 : i32
    %c0_i32_0 = arith.constant 0 : i32
    %c0_i32_1 = arith.constant 0 : i32
    %c0_i32_2 = arith.constant 0 : i32
    return %c0_i32, %c0_i32_0, %c0_i32_1 : i32, i32, i32
  }
  func.func @transform_7(%arg0: i32) -> (i32, i32, i32) {
    %c0_i32 = arith.constant 0 : i32
    %c0_i32_0 = arith.constant 0 : i32
    %c0_i32_1 = arith.constant 0 : i32
    %c0_i32_2 = arith.constant 0 : i32
    return %c0_i32, %c0_i32_0, %c0_i32_1 : i32, i32, i32
  }
  func.func @transform_8(%arg0: i32) -> (i32, i32, i32) {
    %c0_i32 = arith.constant 0 : i32
    %c0_i32_0 = arith.constant 0 : i32
    %c0_i32_1 = arith.constant 0 : i32
    %c0_i32_2 = arith.constant 0 : i32
    return %c0_i32, %c0_i32_0, %c0_i32_1 : i32, i32, i32
  }
  func.func @transform_9(%arg0: i32) -> (i32, i32, i32) {
    %c0_i32 = arith.constant 0 : i32
    %c0_i32_0 = arith.constant 0 : i32
    %c0_i32_1 = arith.constant 0 : i32
    %c0_i32_2 = arith.constant 0 : i32
    return %c0_i32, %c0_i32_0, %c0_i32_1 : i32, i32, i32
  }
  func.func @transform_10(%arg0: i32) -> (i32, i32, i32) {
    %c0_i32 = arith.constant 0 : i32
    %c0_i32_0 = arith.constant 0 : i32
    %c0_i32_1 = arith.constant 0 : i32
    %c0_i32_2 = arith.constant 0 : i32
    return %c0_i32, %c0_i32_0, %c0_i32_1 : i32, i32, i32
  }
  func.func @transform_11(%arg0: i32) -> (i32, i32) {
    %c0_i32 = arith.constant 0 : i32
    %c0_i32_0 = arith.constant 0 : i32
    return %arg0, %c0_i32 : i32, i32
  }
}

module attributes {stable_mosaic.version = 11 : i64} {
  func.func @classifier_kernel(%arg0: i32, %arg1: memref<16x64xf32, #tpu.memory_space<vmem>>, %arg2: memref<64x256xbf16, #tpu.memory_space<vmem>>, %arg3: memref<1x256xf32, #tpu.memory_space<vmem>>, %arg4: memref<16x256xf32, #tpu.memory_space<vmem>>) attributes {dimension_semantics = [#tpu.dimension_semantics<parallel>], iteration_bounds = array<i64: 1>, scalar_prefetch = 0 : i64, scratch_operands = 0 : i64, tpu.core_type = #tpu.core_type<tc>, window_params = [{transform_indices = @transform_0, window_bounds = array<i64: 16, 64>}, {pipeline_mode = #tpu.pipeline_mode<synchronous>, transform_indices = @transform_1, window_bounds = array<i64: 64, 256>}, {pipeline_mode = #tpu.pipeline_mode<synchronous>, transform_indices = @transform_2, window_bounds = array<i64: 1, 256>}, {transform_indices = @transform_3, window_bounds = array<i64: 16, 256>}]} {
    %c0 = arith.constant 0 : index
    %c0_0 = arith.constant 0 : index
    %0 = vector.load %arg1[%c0, %c0_0] : memref<16x64xf32, #tpu.memory_space<vmem>>, vector<16x64xf32>
    %1 = arith.truncf %0 : vector<16x64xf32> to vector<16x64xbf16>
    %c0_1 = arith.constant 0 : index
    %c0_2 = arith.constant 0 : index
    %2 = vector.load %arg2[%c0_1, %c0_2] : memref<64x256xbf16, #tpu.memory_space<vmem>>, vector<64x256xbf16>
    %cst = arith.constant dense<0.000000e+00> : vector<16x256xf32>
    %3 = tpu.matmul %1, %2, %cst {dimension_numbers = #tpu.dot_dimension_numbers<[1], [0], [0], [1], [0, 0, 1, 1], [], []>} : vector<16x64xbf16>, vector<64x256xbf16>, vector<16x256xf32> -> vector<16x256xf32>
    %c0_3 = arith.constant 0 : index
    %c0_4 = arith.constant 0 : index
    %4 = vector.load %arg3[%c0_3, %c0_4] : memref<1x256xf32, #tpu.memory_space<vmem>>, vector<1x256xf32>
    %5 = vector.broadcast %4 : vector<1x256xf32> to vector<16x256xf32>
    %6 = arith.addf %3, %5 : vector<16x256xf32>
    %c0_5 = arith.constant 0 : index
    %c0_6 = arith.constant 0 : index
    %7 = vector.load %arg4[%c0_5, %c0_6] : memref<16x256xf32, #tpu.memory_space<vmem>>, vector<16x256xf32>
    tpu.vector_store %arg4[%c0_5, %c0_6], %6 {strides = array<i32>} : memref<16x256xf32, #tpu.memory_space<vmem>>, vector<16x256xf32>,
    return
  }
  func.func @transform_0(%arg0: i32) -> (i32, i32) {
    %c0_i32 = arith.constant 0 : i32
    %c0_i32_0 = arith.constant 0 : i32
    return %arg0, %c0_i32 : i32, i32
  }
  func.func @transform_1(%arg0: i32) -> (i32, i32) {
    %c0_i32 = arith.constant 0 : i32
    %c0_i32_0 = arith.constant 0 : i32
    %c0_i32_1 = arith.constant 0 : i32
    return %c0_i32, %c0_i32_0 : i32, i32
  }
  func.func @transform_2(%arg0: i32) -> (i32, i32) {
    %c0_i32 = arith.constant 0 : i32
    %c0_i32_0 = arith.constant 0 : i32
    %c0_i32_1 = arith.constant 0 : i32
    return %c0_i32, %c0_i32_0 : i32, i32
  }
  func.func @transform_3(%arg0: i32) -> (i32, i32) {
    %c0_i32 = arith.constant 0 : i32
    %c0_i32_0 = arith.constant 0 : i32
    return %arg0, %c0_i32 : i32, i32
  }
}

</mosaic_0001>

<bundles_post_ra>
// kernel: forward.4
= control target key start
LH: loop header
LB: loop body
LE: loop exit
PB: predicated region body
PF: predicated region fallthrough
CT: control target
= control target key end

     0   :  { %s1304_s17 = smov 0   ;;  %s1444_s0 = inlined_call_operand.vmem [shape: f32[16,64], index: 0, kind: input, shape index: {}]   ;;  %s1445_s1 = inlined_call_operand.vmem [shape: f32[20,1,64], index: 1, kind: input, shape index: {}]   ;;  %s1446_s2 = inlined_call_operand.vmem [shape: f32[20,1,64], index: 2, kind: input, shape index: {}]   ;;  %s1447_s3 = inlined_call_operand.vmem [shape: f32[20,1,128], index: 3, kind: input, shape index: {}]   ;;  %s1448_s4 = inlined_call_operand.vmem [shape: f32[20,1,128], index: 4, kind: input, shape index: {}]   ;;  %s1449_s5 = inlined_call_operand.vmem [shape: bf16[20,64,256], index: 5, kind: input, shape index: {}]   ;;  %s1450_s6 = inlined_call_operand.vmem [shape: bf16[20,128,64], index: 6, kind: input, shape index: {}]   ;;  %s1451_s7 = inlined_call_operand.vmem [shape: bf16[20,128,64], index: 7, kind: input, shape index: {}]   ;;  %s1452_s8 = inlined_call_operand.vmem [shape: f32[20,1,64], index: 8, kind: input, shape index: {}]   ;;  %s1453_s9 = inlined_call_operand.vmem [shape: bf16[20,64,256], index: 9, kind: input, shape index: {}]   ;;  %s1454_s10 = inlined_call_operand.vmem [shape: f32[20,1,256], index: 10, kind: input, shape index: {}]   ;;  %s1455_s11 = inlined_call_operand.vmem [shape: f32[16,64], index: 11, kind: output, shape index: {}]  }
   0x1 LB: > { %s1025_s18 = sadd.s32 4294967295, %s1231_s17   ;;  %p1029_p0 = scmp.ge.s32.totalorder %s1231_s17, 1  ;;  %s1231_s17 = sphi %s1304_s17, %s21_s17  }
   0x2   : > { %p336_p1 = scmp.lt.s32.totalorder %s1231_s17, 3 }
   0x4   : > { %p337_p2 = pnand %p1029_p0, %p336_p1 }
   0x5   : > { %p374_p3 = scmp.lt.s32.totalorder (!%p337_p2), %s1025_s18, 1  ;;  %s1327_s26 = smov (!%p337_p2), 0  }
   0x6   : > { %340 = sbr.rel (%p337_p2) target bundleno = 1014 (0x3f6), region = 64 }
   0xb   : > { %v383_v0 = vlaneseq  ;;  %s1458_s18 = smov (!%p374_p3, %s1025_s18), 1 }
   0xc   : > { %s1030_s19 = sshll.u32 %s1458_s18, 3 }
   0xd   : > { %v1312_v1 = vshrl.u32 %v383_v0, 7  ;;  %s377_s22 = scalar_lea.vmem %s1444_s0, %s1030_s19  ;;  %s1323_s25 = scalar_lea.vmem %s1455_s11, %s1030_s19 }
   0xe   : > { %v388_v2 = vld [vmem:[%s377_s22] sm:$0xff]  }
   0xf   : > { %vm385_vm0 = vcmp.ge.s32.totalorder %v1312_v1, 1  ;;  %vm386_vm1 = vcmp.ge.s32.totalorder %v1312_v1, 2  ;;  %vm387_vm2 = vcmp.ge.s32.totalorder %v1312_v1, 4 }
  0x10 LB: >> { %vm466_vm3 = vcmask 523264   ;;  %v1241_v9 = vmov 0   ;;  %s1341_s27 = sshll.u32 %s1239_s26, 6  ;;  %s396_s21 = scalar_lea.vmem %s1445_s1, %s1239_s26  ;;  %v1242_v30 = vmov 0.0   ;;  %vm1243_vm4 = vmmov 0   ;;  %s1239_s26 = sphi %s1327_s26, %s394_s26   ;;  %v1235_v2 = vphi %v388_v2, %v1456_v2  }
  0x11   : >> { %v467_v3 = vsel %vm466_vm3, %v1235_v2, 0.0  ;;  %571 = vmatprep.mubr.bf16.mxu0 %v1241_v9  ;;  %s406_s30 = scalar_lea.vmem %s1449_s5, %s1341_s27  ;;  %s1351_s14 = scalar_lea.vmem %s1451_s7, %s1341_s27  ;;  %v1038_v22 = vld [vmem:[%s396_s21] ss:$0 sm:$0xff]  ;;  %1102 = vmatprep.subr.bf16.mxu1 %v1242_v30 }
  0x12   : >> { %468 = vadd.xlane.f32.xlu0 %v467_v3  ;;  %v1169_v10 = vld [vmem:[%s406_s30 + $0x34] ss:$8 sps:$4 sm:$0xff]   ;;  %v1171_v11 = vld [vmem:[%s406_s30 + $0x30] ss:$8 sps:$4 sm:$0xff]   ;;  %v1172_v12 = vld [vmem:[%s406_s30 + $0x24] ss:$8 sps:$4 sm:$0xff]   ;;  %s1357_s18 = scalar_lea.vmem %s1450_s6, %s1341_s27  ;;  %s398_s24 = scalar_lea.vmem %s1446_s2, %s1239_s26  ;;  %1118 = vmatprep.mubr.msk.bf16.mxu1 %vm1243_vm4, %v1242_v30 }
  0x13   : >> { %547 = vmatprep.subr.bf16.mxu0 %v1169_v10  ;;  %v1174_v13 = vld [vmem:[%s406_s30 + $0x20] ss:$8 sps:$4 sm:$0xff]   ;;  %v1175_v14 = vld [vmem:[%s406_s30 + $0x14] ss:$8 sps:$4 sm:$0xff]   ;;  %v1177_v15 = vld [vmem:[%s406_s30 + $0x10] ss:$8 sps:$4 sm:$0xff]   ;;  %s402_s15 = scalar_lea.vmem %s1448_s4, %s1239_s26 }
  0x14   : >> { %548 = vmatpush1.bf16.msra.mxu0 %v1171_v11  ;;  %v1178_v16 = vld [vmem:[%s406_s30 + $0x4] ss:$8 sps:$4 sm:$0xff]   ;;  %v1180_v17 = vld [vmem:[%s406_s30] ss:$8 sps:$4 sm:$0xff]   ;;  %v1181_v28 = vld [vmem:[%s1351_s14 + $0x38] sm:$0xff]   ;;  %s400_s30 = scalar_lea.vmem %s1447_s3, %s1239_s26  ;;  %s1037_s21 = sshll.u32 %s1239_s26, 1 }
  0x15   : >> { %549 = vmatprep.subr.bf16.mxu0 %v1172_v12  ;;  %v1039_v24 = vld [vmem:[%s398_s24] ss:$0 sm:$0xff]  ;;  %v1182_v29 = vld [vmem:[%s1357_s18 + $0x38] sm:$0xff]   ;;  %1103 = vmatpush3.bf16.msra.mxu1 %v1181_v28  ;;  %v1183_v31 = vld [vmem:[%s1351_s14 + $0x30] sm:$0xff]   ;;  %s464_s24 = scalar_lea.vmem %s1454_s10, %s1037_s21 }
  0x16   : >> { %1104 = vmatprep.subr.bf16.mxu1 %v1242_v30  ;;  %v1184_v32 = vld [vmem:[%s1357_s18 + $0x30] sm:$0xff]   ;;  %v1185_v33 = vld [vmem:[%s1351_s14 + $0x28] sm:$0xff]   ;;  %v1187_v35 = vld [vmem:[%s1351_s14 + $0x20] sm:$0xff]  }
  0x17   : >> { %v1186_v34 = vld [vmem:[%s1357_s18 + $0x28] sm:$0xff]   ;;  %v1188_v36 = vld [vmem:[%s1357_s18 + $0x20] sm:$0xff]   ;;  %v1189_v37 = vld [vmem:[%s1351_s14 + $0x18] sm:$0xff]  }
  0x18   : >> { %550 = vmatpush1.bf16.msra.mxu0 %v1174_v13  ;;  %v1190_v38 = vld [vmem:[%s1357_s18 + $0x18] sm:$0xff]   ;;  %v1191_v39 = vld [vmem:[%s1351_s14 + $0x10] sm:$0xff]   ;;  %v1193_v41 = vld [vmem:[%s1351_s14 + $0x8] sm:$0xff]  }
  0x19   : >> { %551 = vmatprep.subr.bf16.mxu0 %v1175_v14  ;;  %1105 = vmatpush3.bf16.msra.mxu1 %v1183_v31  ;;  %v1192_v40 = vld [vmem:[%s1357_s18 + $0x10] sm:$0xff]   ;;  %v1194_v42 = vld [vmem:[%s1357_s18 + $0x8] sm:$0xff]   ;;  %v1195_v43 = vld [vmem:[%s1351_s14] sm:$0xff]  }
  0x1a   : >> { %1106 = vmatprep.subr.bf16.mxu1 %v1242_v30  ;;  %v1196_v44 = vld [vmem:[%s1357_s18] sm:$0xff]   ;;  %s454_s18 = scalar_lea.vmem %s1453_s9, %s1341_s27  ;;  %s451_s27 = scalar_lea.vmem %s1452_s8, %s1239_s26 }
  0x1b   : >> { %v1049_v45 = vld [vmem:[%s400_s30] ss:$0 sm:$0xff]  ;;  %s394_s26 = sadd.s32 1, %s1239_s26  }
  0x1c   : >> { %552 = vmatpush1.bf16.msra.mxu0 %v1177_v15  ;;  %v1050_v46 = vld [vmem:[%s402_s15] ss:$0 sm:$0xff]  ;;  %v592_v47 = vrot.slane %v1049_v45, 7  ;;  %p391_p4 = scmp.ge.s32.totalorder %s394_s26, 20  }
  0x1d   : >> { %553 = vmatprep.subr.bf16.mxu0 %v1178_v16  ;;  %1107 = vmatpush3.bf16.msra.mxu1 %v1185_v33  ;;  %v594_v48 = vrot.slane %v1050_v46, 7 }
  0x1e   : >> { %1108 = vmatprep.subr.bf16.mxu1 %v1242_v30  ;;  %v593_v49 = vsel %vm385_vm0, %v592_v47, 1.0 }
  0x1f   : >> { %v595_v50 = vsel %vm385_vm0, %v594_v48, 0.0  ;;  %v608_v53 = vmul.f32 %v1049_v45, %v593_v49  ;;  %v612_v58 = vmul.f32 %v1050_v46, %v593_v49  ;;  %v1199_v49 = vld [vmem:[%s454_s18 + $0x34] ss:$8 sps:$4 sm:$0xff]  }
  0x20   : >> { %554 = vmatpush1.bf16.msra.mxu0 %v1180_v17  ;;  %v609_v54 = vmul.f32 %v1050_v46, %v595_v50  ;;  %v611_v57 = vmul.f32 %v1049_v45, %v595_v50  ;;  %v1197_v50 = vld [vmem:[%s454_s18 + $0x30] ss:$8 sps:$4 sm:$0xff]  }
  0x21   : >> { %1122 = vmatprep.subr.bf16.mxu0 %v1242_v30  ;;  %1109 = vmatpush3.bf16.msra.mxu1 %v1187_v35 }
  0x22   : >> { %1110 = vmatprep.subr.bf16.mxu1 %v1242_v30 }
  0x25   : >> { %1111 = vmatpush3.bf16.msra.mxu1 %v1189_v37 }
  0x26   : >> { %1112 = vmatprep.subr.bf16.mxu1 %v1242_v30 }
  0x29   : >> { %1113 = vmatpush3.bf16.msra.mxu1 %v1191_v39 }
  0x2a   : >> { %1114 = vmatprep.subr.bf16.mxu1 %v1242_v30 }
  0x2d   : >> { %1115 = vmatpush3.bf16.msra.mxu1 %v1193_v41 }
  0x2e   : >> { %1116 = vmatprep.subr.bf16.mxu1 %v1242_v30 }
  0x31   : >> { %1117 = vmatpush3.bf16.msra.mxu1 %v1195_v43 }
  0x32   : >> { %906 = vmatprep.subr.bf16.mxu1 %v1199_v49 }
  0x9b   : >> { %v469_v4 = vpop.xlane.xlu0 %468 }
  0x9c   : >> { %v471_v5 = vmul.f32 0.015625, %v469_v4 }
  0x9e   : >> { %v472_v6 = vsub.f32 %v1235_v2, %v471_v5  ;;  %v610_v5 = vsub.f32 %v608_v53, %v609_v54  ;;  %v1205_v53 = vld [vmem:[%s454_s18 + $0x14] ss:$8 sps:$4 sm:$0xff]   ;;  %v1203_v54 = vld [vmem:[%s454_s18 + $0x10] ss:$8 sps:$4 sm:$0xff]  }
  0xa0   : >> { %v473_v7 = vmul.f32 %v472_v6, %v472_v6  ;;  %v614_v10 = vrot.slane %v610_v5, 6 }
  0xa2   : >> { %v474_v8 = vsel %vm466_vm3, %v473_v7, 0.0  ;;  %v615_v16 = vsel %vm386_vm1, %v614_v10, 1.0 }
  0xa3   : >> { %475 = vadd.xlane.f32.xlu0 %v474_v8 }
 0x12c   : >> { %v476_v18 = vpop.xlane.xlu0 %475 }
 0x12d   : >> { %v477_v19 = vmul.f32 0.015625, %v476_v18 }
 0x12f   : >> { %v478_v20 = vadd.f32 1e-05, %v477_v19 }
 0x131   : >> { %1209 = vrsqrt.f32 %v478_v20 }
 0x13e   : >> { %v1210_v21 = vpop.eup %1209 }
 0x13f   : >> { %v480_v23 = vmul.f32 %v1210_v21, %v472_v6  ;;  %v613_v6 = vadd.f32 %v612_v58, %v611_v57 }
 0x141   : >> { %v487_v25 = vmul.f32 %v1038_v22, %v480_v23  ;;  %v616_v11 = vrot.slane %v613_v6, 6  ;;  %v634_v28 = vmul.f32 %v615_v16, %v613_v6 }
 0x143   : >> { %v1367_v26 = vadd.f32 %v1039_v24, %v487_v25  ;;  %v617_v17 = vsel %vm386_vm1, %v616_v11, 0.0  ;;  %v630_v24 = vmul.f32 %v615_v16, %v610_v5 }
 0x144   : >> { %v631_v25 = vmul.f32 %v617_v17, %v613_v6 }
 0x145   : >> { %v495_v27 = vpack.c.bf16 %v1367_v26, %v1367_v26 }
 0x146   : >> { %v632_v33 = vsub.f32 %v630_v24, %v631_v25 }
 0x147   : >> { %1048 = vmatmul.mubr.msk.bf16.vlgmr.msra.gmra.mxu0 %vm466_vm3, %v495_v27  ;;  %v633_v27 = vmul.f32 %v617_v17, %v610_v5  ;;  %v465_v17 = vld [vmem:[%s464_s24] sm:$0x3] }
 0x148   : >> { %1123 = vmatpush3.bf16.msra.mxu0 %v1182_v29  ;;  %1138 = vmatprep.mubr.msk.bf16.mxu0 %vm1243_vm4, %v1242_v30 }
 0x149   : >> { %1124 = vmatprep.subr.bf16.mxu0 %v1242_v30 }
 0x14c   : >> { %1125 = vmatpush3.bf16.msra.mxu0 %v1184_v32 }
 0x14d   : >> { %1126 = vmatprep.subr.bf16.mxu0 %v1242_v30 }
 0x150   : >> { %1127 = vmatpush3.bf16.msra.mxu0 %v1186_v34  ;;  %v635_v34 = vadd.f32 %v634_v28, %v633_v27  ;;  %v847_v28 = vsub.s32 0, %v1312_v1 }
 0x151   : >> { %1128 = vmatprep.subr.bf16.mxu0 %v1242_v30 }
 0x154   : >> { %1129 = vmatpush3.bf16.msra.mxu0 %v1188_v36 }
 0x155   : >> { %1130 = vmatprep.subr.bf16.mxu0 %v1242_v30 }
 0x158   : >> { %1131 = vmatpush3.bf16.msra.mxu0 %v1190_v38 }
 0x159   : >> { %1132 = vmatprep.subr.bf16.mxu0 %v1242_v30 }
 0x15c   : >> { %1133 = vmatpush3.bf16.msra.mxu0 %v1192_v40 }
 0x15d   : >> { %1134 = vmatprep.subr.bf16.mxu0 %v1242_v30 }
 0x160   : >> { %1135 = vmatpush3.bf16.msra.mxu0 %v1194_v42 }
 0x161   : >> { %1136 = vmatprep.subr.bf16.mxu0 %v1242_v30 }
 0x164   : >> { %1137 = vmatpush3.bf16.msra.mxu0 %v1196_v44 }
 0x207   : >> { %v573_v51 = vpop.f32.mrf.mxu0 }
 0x208   : >> { %v596_v52 = vrot.slane %v573_v51, 7 }
 0x209   : >> { %v575_v55 = vpop.f32.mrf.mxu0 }
 0x20a   : >> { %v597_v56 = vsel %vm385_vm0, %v596_v52, 0.0  ;;  %v598_v59 = vrot.slane %v575_v55, 7  ;;  %v1200_v52 = vld [vmem:[%s454_s18 + $0x20] ss:$8 sps:$4 sm:$0xff]  }
 0x20b   : >> { %v577_v60 = vpop.f32.mrf.mxu0  ;;  %v600_v62 = vmul.f32 %v1049_v45, %v597_v56  ;;  %v605_v63 = vmul.f32 %v1050_v46, %v597_v56  ;;  %v1206_v56 = vld [vmem:[%s454_s18] ss:$8 sps:$4 sm:$0xff]  }
 0x20c   : >> { %v599_v61 = vsel %vm385_vm0, %v598_v59, 0.0 }
 0x20d   : >> { %v601_v0 = vmul.f32 %v1050_v46, %v599_v61  ;;  %v604_v3 = vmul.f32 %v1049_v45, %v599_v61  ;;  %v578_v4 = vpop.f32.mrf.mxu0 }
 0x20f   : >> { %v602_v7 = vsub.f32 %v600_v62, %v601_v0  ;;  %v606_v8 = vadd.f32 %v605_v63, %v604_v3 }
 0x211   : >> { %v603_v12 = vadd.f32 %v602_v7, %v573_v51  ;;  %v607_v13 = vadd.f32 %v606_v8, %v575_v55  ;;  %v1202_v51 = vld [vmem:[%s454_s18 + $0x24] ss:$8 sps:$4 sm:$0xff]  }
 0x212   : >> { %v1208_v55 = vld [vmem:[%s454_s18 + $0x4] ss:$8 sps:$4 sm:$0xff]  }
 0x213   : >> { %v618_v14 = vrot.slane %v603_v12, 6  ;;  %v620_v15 = vrot.slane %v607_v13, 6 }
 0x215   : >> { %v619_v18 = vsel %vm386_vm1, %v618_v14, 0.0  ;;  %v621_v19 = vsel %vm386_vm1, %v620_v15, 0.0 }
 0x216   : >> { %v622_v20 = vmul.f32 %v619_v18, %v610_v5  ;;  %v623_v21 = vmul.f32 %v621_v19, %v613_v6  ;;  %v626_v22 = vmul.f32 %v621_v19, %v610_v5  ;;  %v627_v23 = vmul.f32 %v619_v18, %v613_v6 }
 0x218   : >> { %v624_v29 = vsub.f32 %v622_v20, %v623_v21  ;;  %v628_v30 = vadd.f32 %v627_v23, %v626_v22 }
 0x21a   : >> { %v625_v31 = vadd.f32 %v624_v29, %v603_v12  ;;  %v629_v32 = vadd.f32 %v628_v30, %v607_v13  ;;  %v848_v29 = vrot.slane %v465_v17, %v847_v28 }
 0x21c   : >> { %v636_v35 = vrot.slane %v625_v31, 4  ;;  %v638_v36 = vrot.slane %v629_v32, 4 }
 0x21e   : >> { %v637_v37 = vsel %vm387_vm2, %v636_v35, 0.0  ;;  %v639_v38 = vsel %vm387_vm2, %v638_v36, 0.0 }
 0x21f   : >> { %v640_v39 = vmul.f32 %v637_v37, %v632_v33  ;;  %v641_v40 = vmul.f32 %v639_v38, %v635_v34  ;;  %v644_v41 = vmul.f32 %v639_v38, %v632_v33  ;;  %v645_v42 = vmul.f32 %v637_v37, %v635_v34 }
 0x221   : >> { %v642_v43 = vsub.f32 %v640_v39, %v641_v40  ;;  %v646_v44 = vadd.f32 %v645_v42, %v644_v41 }
 0x223   : >> { %v647_v45 = vadd.f32 %v646_v44, %v629_v32  ;;  %v643_v46 = vadd.f32 %v642_v43, %v625_v31 }
 0x225   : >> { %v649_v47 = vpack.c.bf16 %v647_v45, %v647_v45  ;;  %v648_v48 = vpack.c.bf16 %v643_v46, %v643_v46 }
 0x227   : >> { %1119 = vmatmul.mubr.bf16.vlgmr.msra.gmra.mxu1 %v649_v47  ;;  %1139 = vmatmul.mubr.bf16.vlgmr.msra.gmra.mxu0 %v648_v48 }
 0x228   : >> { %930 = vmatprep.mubr.bf16.mxu1 %v1241_v9  ;;  %907 = vmatpush1.bf16.msra.mxu1 %v1197_v50  ;;  %v1067_v9 = vld [vmem:[%s451_s27] ss:$0 sm:$0xff] }
 0x229   : >> { %908 = vmatprep.subr.bf16.mxu1 %v1202_v51  ;;  %v832_v60 = vmul.f32 %v1067_v9, %v1367_v26  ;;  %v851_v26 = vsub.s32 1, %v1312_v1 }
 0x22b   : >> { %v852_v18 = vrot.slane %v465_v17, %v851_v26 }
 0x22c   : >> { %909 = vmatpush1.bf16.msra.mxu1 %v1200_v52 }
 0x22d   : >> { %910 = vmatprep.subr.bf16.mxu1 %v1205_v53 }
 0x230   : >> { %911 = vmatpush1.bf16.msra.mxu1 %v1203_v54 }
 0x231   : >> { %912 = vmatprep.subr.bf16.mxu1 %v1208_v55 }
 0x234   : >> { %913 = vmatpush1.bf16.msra.mxu1 %v1206_v56 }
 0x2e7   : >> { %v732_v57 = vpop.f32.mrf.mxu1  ;;  %v820_v58 = vpop.f32.mrf.mxu0 }
 0x2e8   : >> { %v821_v59 = vadd.f32 %v820_v58, %v732_v57 }
 0x2e9   : >> { %v1120_v61 = vpop.f32.mrf.mxu1  ;;  %v1140_v62 = vpop.f32.mrf.mxu0 }
 0x2ea   : >> { %v833_v63 = vadd.f32 %v832_v60, %v821_v59 }
 0x2eb   : >> { %v735_v0 = vpop.f32.mrf.mxu1  ;;  %v823_v3 = vpop.f32.mrf.mxu0 }
 0x2ec   : >> { %v834_v4 = vmul.f32 %v833_v63, %v833_v63 }
 0x2ed   : >> { %v1121_v5 = vpop.f32.mrf.mxu1  ;;  %v1141_v6 = vpop.f32.mrf.mxu0 }
 0x2ee   : >> { %v835_v7 = vmul.f32 %v834_v4, %v833_v63 }
 0x2f0   : >> { %v836_v8 = vmul.f32 0.044715, %v835_v7 }
 0x2f2   : >> { %v837_v10 = vadd.f32 %v836_v8, %v833_v63 }
 0x2f4   : >> { %v838_v11 = vmul.f32 0.7978846, %v837_v10 }
 0x2f6   : >> { %1211 = vtanh.f32 %v838_v11 }
 0x303   : >> { %v1212_v12 = vpop.eup %1211 }
 0x304   : >> { %v840_v13 = vadd.f32 1.0, %v1212_v12 }
 0x306   : >> { %v841_v14 = vmul.f32 0.5, %v840_v13 }
 0x308   : >> { %v842_v15 = vmul.f32 %v841_v14, %v833_v63 }
 0x30a   : >> { %v843_v16 = vpack.c.bf16 %v842_v15, %v842_v15 }
 0x30c   : >> { %1076 = vmatmul.mubr.msk.bf16.vlgmr.msra.gmra.mxu1 %vm466_vm3, %v843_v16 }
 0x3cc   : >> { %v932_v19 = vpop.f32.mrf.mxu1 }
 0x3cd   : >> { %v933_v30 = vadd.f32 %v932_v19, %v848_v29 }
 0x3ce   : >> { %v934_v20 = vpop.f32.mrf.mxu1 }
 0x3cf   : >> { %v935_v21 = vadd.f32 %v934_v20, %v852_v18 }
 0x3d0   : >> { %v936_v22 = vpop.f32.mrf.mxu1 }
 0x3d1   : >> { %v1077_v23 = vmul.f32 -1.442695, %v935_v21 }
 0x3d2   : >> { %v937_v24 = vpop.f32.mrf.mxu1 }
 0x3d3   : >> { %1213 = vpow2.f32 %v1077_v23 }
 0x3e0   : >> { %v1214_v25 = vpop.eup %1213 }
 0x3e1   : >> { %v942_v27 = vadd.f32 1.0, %v1214_v25 }
 0x3e3   : >> { %1215 = vrcp.f32 %v942_v27 }
 0x3f0   : >> { %v1216_v31 = vpop.eup %1215 }
 0x3f1   : >> { %v945_v32 = vmul.f32 %v1216_v31, %v933_v30  ;;  %393 = sbr.rel (!%p391_p4) target bundleno = 16 (0x10), region = 111 }
 0x3f3   : >> { %v946_v33 = vadd.f32 %v1235_v2, %v945_v32  }
 0x3f5   : >> { %v1456_v2 = vmov %v946_v33  ;;  %948 = vst.msk [vmem:[%s1323_s25] sm:$0xff] (%p391_p4), %vm466_vm3, %v946_v33 }
 0x3f6 PF: > { %s21_s17 = sadd.s32 1, %s1231_s17  }
 0x3f7   : > { %p18_p5 = scmp.ge.s32.totalorder %s21_s17, 4  }
 0x3f9   :  { %20 = sbr.rel (!%p18_p5) target bundleno = 1 (0x1), region = 122 }

// kernel: forward.3
= control target key start
LH: loop header
LB: loop body
LE: loop exit
PB: predicated region body
PF: predicated region fallthrough
CT: control target
= control target key end

     0   :  { %vm1833_vm0 = vcmask 523264   ;;  %s3320_s0 = inlined_call_operand.vmem [shape: f32[16,2048], index: 0, kind: input, shape index: {}]   ;;  %s3321_s3 = inlined_call_operand.vmem [shape: bf16[2048,64], index: 3, kind: input, shape index: {}]   ;;  %s3322_s1 = inlined_call_operand.vmem [shape: f32[1,2048], index: 1, kind: input, shape index: {}]   ;;  %s3323_s2 = inlined_call_operand.vmem [shape: f32[1,2048], index: 2, kind: input, shape index: {}]   ;;  %s3324_s4 = inlined_call_operand.vmem [shape: f32[1,64], index: 4, kind: input, shape index: {}]   ;;  %s3325_s5 = inlined_call_operand.vmem [shape: f32[16,64], index: 5, kind: output, shape index: {}]  }
   0x1   :  { %v2310_v0 = vld [vmem:[%s3320_s0] sm:$0xff]  ;;  %v2315_v1 = vld [vmem:[%s3320_s0 + $0x8] sm:$0xff]  ;;  %v2320_v2 = vld [vmem:[%s3320_s0 + $0x10] sm:$0xff] }
   0x2   :  { %v53_v3 = vadd.f32 %v2315_v1, %v2310_v0  ;;  %v2327_v4 = vld [vmem:[%s3320_s0 + $0x18] sm:$0xff]  ;;  %v2333_v6 = vld [vmem:[%s3320_s0 + $0x20] sm:$0xff]  ;;  %v2344_v9 = vld [vmem:[%s3320_s0 + $0x88] sm:$0xff] }
   0x3   :  { %v2339_v8 = vld [vmem:[%s3320_s0 + $0x80] sm:$0xff]  ;;  %v2349_v10 = vld [vmem:[%s3320_s0 + $0x28] sm:$0xff]  ;;  %v2354_v11 = vld [vmem:[%s3320_s0 + $0x90] sm:$0xff] }
   0x4   :  { %v54_v5 = vadd.f32 %v53_v3, %v2320_v2  ;;  %v70_v12 = vadd.f32 %v2344_v9, %v2339_v8  ;;  %v2362_v14 = vld [vmem:[%s3320_s0 + $0x98] sm:$0xff]  ;;  %v2367_v15 = vld [vmem:[%s3320_s0 + $0x30] sm:$0xff]  ;;  %v2374_v18 = vld [vmem:[%s3320_s0 + $0xa0] sm:$0xff] }
   0x5   :  { %v2379_v19 = vld [vmem:[%s3320_s0 + $0x38] sm:$0xff]  ;;  %v2386_v22 = vld [vmem:[%s3320_s0 + $0xa8] sm:$0xff]  ;;  %v2391_v23 = vld [vmem:[%s3320_s0 + $0x40] sm:$0xff] }
   0x6   :  { %v55_v7 = vadd.f32 %v54_v5, %v2327_v4  ;;  %v71_v16 = vadd.f32 %v70_v12, %v2354_v11  ;;  %v2398_v26 = vld [vmem:[%s3320_s0 + $0xb0] sm:$0xff]  ;;  %v2403_v27 = vld [vmem:[%s3320_s0 + $0x48] sm:$0xff]  ;;  %v2410_v30 = vld [vmem:[%s3320_s0 + $0xb8] sm:$0xff] }
   0x7   :  { %v2415_v31 = vld [vmem:[%s3320_s0 + $0x50] sm:$0xff]  ;;  %v2422_v34 = vld [vmem:[%s3320_s0 + $0xc0] sm:$0xff]  ;;  %v2427_v35 = vld [vmem:[%s3320_s0 + $0x58] sm:$0xff] }
   0x8   :  { %v56_v13 = vadd.f32 %v55_v7, %v2333_v6  ;;  %v72_v20 = vadd.f32 %v71_v16, %v2362_v14  ;;  %v2434_v38 = vld [vmem:[%s3320_s0 + $0xc8] sm:$0xff]  ;;  %v2439_v39 = vld [vmem:[%s3320_s0 + $0x60] sm:$0xff]  ;;  %v2446_v42 = vld [vmem:[%s3320_s0 + $0xd0] sm:$0xff] }
   0x9   :  { %v2451_v43 = vld [vmem:[%s3320_s0 + $0x68] sm:$0xff]  ;;  %v2458_v46 = vld [vmem:[%s3320_s0 + $0xd8] sm:$0xff]  ;;  %v2463_v47 = vld [vmem:[%s3320_s0 + $0x70] sm:$0xff] }
   0xa   :  { %v57_v17 = vadd.f32 %v56_v13, %v2349_v10  ;;  %v73_v24 = vadd.f32 %v72_v20, %v2374_v18  ;;  %v2470_v50 = vld [vmem:[%s3320_s0 + $0xe0] sm:$0xff]  ;;  %v2475_v51 = vld [vmem:[%s3320_s0 + $0x78] sm:$0xff]  ;;  %v2482_v54 = vld [vmem:[%s3320_s0 + $0xe8] sm:$0xff] }
   0xb   :  { %v2489_v57 = vld [vmem:[%s3320_s0 + $0xf0] sm:$0xff]  ;;  %v2495_v59 = vld [vmem:[%s3320_s0 + $0xf8] sm:$0xff] }
   0xc   :  { %v58_v21 = vadd.f32 %v57_v17, %v2367_v15  ;;  %v74_v28 = vadd.f32 %v73_v24, %v2386_v22  ;;  %v2145_v62 = vld [vmem:[%s3321_s3 + $0x78] sm:$0xff]  }
   0xd   :  { %v2146_v63 = vld [vmem:[%s3321_s3 + $0xf8] sm:$0xff]   ;;  %1969 = vmatprep.subr.bf16.mxu0 %v2145_v62 }
   0xe   :  { %v59_v25 = vadd.f32 %v58_v21, %v2379_v19  ;;  %v75_v32 = vadd.f32 %v74_v28, %v2398_v26  ;;  %v2147_v3 = vld [vmem:[%s3321_s3 + $0x38] sm:$0xff]   ;;  %1991 = vmatprep.subr.bf16.mxu1 %v2146_v63 }
   0xf   :  { %v2148_v5 = vld [vmem:[%s3321_s3 + $0xb8] sm:$0xff]   ;;  %1970 = vmatpush3.bf16.msra.mxu0 %v2147_v3 }
  0x10   :  { %v60_v29 = vadd.f32 %v59_v25, %v2391_v23  ;;  %v76_v36 = vadd.f32 %v75_v32, %v2410_v30  ;;  %1992 = vmatpush3.bf16.msra.mxu1 %v2148_v5 }
  0x12   :  { %v61_v33 = vadd.f32 %v60_v29, %v2403_v27  ;;  %v77_v40 = vadd.f32 %v76_v36, %v2422_v34 }
  0x14   :  { %v62_v37 = vadd.f32 %v61_v33, %v2415_v31  ;;  %v78_v44 = vadd.f32 %v77_v40, %v2434_v38 }
  0x16   :  { %v63_v41 = vadd.f32 %v62_v37, %v2427_v35  ;;  %v79_v48 = vadd.f32 %v78_v44, %v2446_v42 }
  0x18   :  { %v64_v45 = vadd.f32 %v63_v41, %v2439_v39  ;;  %v80_v52 = vadd.f32 %v79_v48, %v2458_v46 }
  0x1a   :  { %v65_v49 = vadd.f32 %v64_v45, %v2451_v43  ;;  %v81_v55 = vadd.f32 %v80_v52, %v2470_v50 }
  0x1c   :  { %v66_v53 = vadd.f32 %v65_v49, %v2463_v47  ;;  %v82_v58 = vadd.f32 %v81_v55, %v2482_v54 }
  0x1e   :  { %v67_v56 = vadd.f32 %v66_v53, %v2475_v51  ;;  %v83_v60 = vadd.f32 %v82_v58, %v2489_v57 }
  0x20   :  { %68 = vadd.xlane.f32.xlu0 %v67_v56  ;;  %v84_v61 = vadd.f32 %v83_v60, %v2495_v59 }
  0x24   :  { %85 = vadd.xlane.f32.xlu0 %v84_v61 }
  0xa9   :  { %v69_v7 = vpop.xlane.xlu0 %68 }
  0xaa   :  { %v2511_v12 = vmul.f32 0.00048828125, %v69_v7 }
  0xac   :  { %v2515_v13 = vsub.f32 %v2310_v0, %v2511_v12  ;;  %v2519_v16 = vsub.f32 %v2315_v1, %v2511_v12  ;;  %v2525_v21 = vsub.f32 %v2320_v2, %v2511_v12  ;;  %v2533_v0 = vsub.f32 %v2327_v4, %v2511_v12 }
  0xad   :  { %v86_v17 = vpop.xlane.xlu0 %85  ;;  %v2537_v1 = vsub.f32 %v2333_v6, %v2511_v12  ;;  %v2551_v4 = vsub.f32 %v2349_v10, %v2511_v12  ;;  %v2557_v36 = vsub.f32 %v2367_v15, %v2511_v12  ;;  %v2571_v41 = vsub.f32 %v2379_v19, %v2511_v12 }
  0xae   :  { %v2521_v20 = vmul.f32 0.00048828125, %v86_v17  ;;  %v122_v24 = vmul.f32 %v2515_v13, %v2515_v13  ;;  %v123_v25 = vmul.f32 %v2519_v16, %v2519_v16  ;;  %v124_v28 = vmul.f32 %v2525_v21, %v2525_v21 }
  0xaf   :  { %3348 = vst [vmem:[#allocation2_spill] sm:$0xff] %v2537_v1  ;;  %v125_v6 = vmul.f32 %v2533_v0, %v2533_v0  ;;  %3349 = vst [vmem:[#allocation3_spill] sm:$0xff] %v2557_v36  ;;  %v127_v15 = vmul.f32 %v2551_v4, %v2551_v4  ;;  %v128_v48 = vmul.f32 %v2557_v36, %v2557_v36 }
  0xb0   :  { %v154_v29 = vadd.f32 %v123_v25, %v122_v24  ;;  %v2543_v2 = vsub.f32 %v2339_v8, %v2521_v20  ;;  %v2547_v32 = vsub.f32 %v2344_v9, %v2521_v20  ;;  %v126_v8 = vmul.f32 %v2537_v1, %v2537_v1 }
  0xb1   :  { %v2563_v9 = vsub.f32 %v2354_v11, %v2521_v20  ;;  %v2577_v45 = vsub.f32 %v2362_v14, %v2521_v20  ;;  %v2581_v11 = vsub.f32 %v2391_v23, %v2511_v12  ;;  %v2587_v19 = vsub.f32 %v2374_v18, %v2521_v20 }
  0xb2   :  { %v155_v33 = vadd.f32 %v154_v29, %v124_v28  ;;  %v138_v10 = vmul.f32 %v2543_v2, %v2543_v2  ;;  %v139_v40 = vmul.f32 %v2547_v32, %v2547_v32  ;;  %v2593_v14 = vsub.f32 %v2403_v27, %v2511_v12 }
  0xb3   :  { %3350 = vst [vmem:[#allocation4_spill] sm:$0xff] %v2587_v19  ;;  %v140_v52 = vmul.f32 %v2563_v9, %v2563_v9  ;;  %v129_v23 = vmul.f32 %v2571_v41, %v2571_v41  ;;  %v2599_v56 = vsub.f32 %v2386_v22, %v2521_v20  ;;  %v141_v18 = vmul.f32 %v2577_v45, %v2577_v45 }
  0xb4   :  { %v156_v37 = vadd.f32 %v155_v33, %v125_v6  ;;  %v171_v53 = vadd.f32 %v139_v40, %v138_v10  ;;  %3351 = vst [vmem:[#allocation5_spill] sm:$0xff] %v2593_v14  ;;  %v2605_v60 = vsub.f32 %v2415_v31, %v2511_v12  ;;  %v130_v27 = vmul.f32 %v2581_v11, %v2581_v11 }
  0xb5   :  { %v2611_v62 = vsub.f32 %v2398_v26, %v2521_v20  ;;  %v142_v22 = vmul.f32 %v2587_v19, %v2587_v19  ;;  %v2617_v3 = vsub.f32 %v2427_v35, %v2511_v12  ;;  %v131_v31 = vmul.f32 %v2593_v14, %v2593_v14 }
  0xb6   :  { %v157_v44 = vadd.f32 %v156_v37, %v126_v8  ;;  %v172_v58 = vadd.f32 %v171_v53, %v140_v52  ;;  %v2623_v7 = vsub.f32 %v2410_v30, %v2521_v20  ;;  %v143_v26 = vmul.f32 %v2599_v56, %v2599_v56 }
  0xb7   :  { %3352 = vst [vmem:[#allocation6_spill] sm:$0xff] %v2611_v62  ;;  %3353 = vst [vmem:[#allocation7_spill] sm:$0xff] %v2617_v3  ;;  %v2629_v24 = vsub.f32 %v2439_v39, %v2511_v12  ;;  %v132_v35 = vmul.f32 %v2605_v60, %v2605_v60  ;;  %v2635_v28 = vsub.f32 %v2422_v34, %v2521_v20 }
  0xb8   :  { %v158_v49 = vadd.f32 %v157_v44, %v127_v15  ;;  %v173_v63 = vadd.f32 %v172_v58, %v141_v18  ;;  %v144_v30 = vmul.f32 %v2611_v62, %v2611_v62  ;;  %v2641_v6 = vsub.f32 %v2451_v43, %v2511_v12 }
  0xb9   :  { %v133_v39 = vmul.f32 %v2617_v3, %v2617_v3  ;;  %v2647_v8 = vsub.f32 %v2434_v38, %v2521_v20  ;;  %v145_v34 = vmul.f32 %v2623_v7, %v2623_v7  ;;  %v2653_v10 = vsub.f32 %v2463_v47, %v2511_v12 }
  0xba   :  { %v159_v55 = vadd.f32 %v158_v49, %v128_v48  ;;  %v174_v17 = vadd.f32 %v173_v63, %v142_v22  ;;  %v134_v43 = vmul.f32 %v2629_v24, %v2629_v24  ;;  %v2659_v15 = vsub.f32 %v2446_v42, %v2521_v20 }
  0xbb   :  { %3354 = vst [vmem:[#allocation8_spill] sm:$0xff] %v2647_v8  ;;  %v146_v38 = vmul.f32 %v2635_v28, %v2635_v28  ;;  %v2665_v48 = vsub.f32 %v2475_v51, %v2511_v12  ;;  %v135_v47 = vmul.f32 %v2641_v6, %v2641_v6  ;;  %v2671_v52 = vsub.f32 %v2458_v46, %v2521_v20 }
  0xbc   :  { %v160_v61 = vadd.f32 %v159_v55, %v129_v23  ;;  %v175_v29 = vadd.f32 %v174_v17, %v143_v26  ;;  %v147_v42 = vmul.f32 %v2647_v8, %v2647_v8  ;;  %v136_v23 = vmul.f32 %v2653_v10, %v2653_v10 }
  0xbd   :  { %3355 = vst [vmem:[#allocation9_spill] sm:$0xff] %v2671_v52  ;;  %v2679_v51 = vsub.f32 %v2470_v50, %v2521_v20  ;;  %v148_v12 = vmul.f32 %v2659_v15, %v2659_v15  ;;  %v137_v46 = vmul.f32 %v2665_v48, %v2665_v48  ;;  %v2693_v50 = vsub.f32 %v2489_v57, %v2521_v20 }
  0xbe   :  { %v161_v5 = vadd.f32 %v160_v61, %v130_v27  ;;  %v176_v37 = vadd.f32 %v175_v29, %v144_v30  ;;  %v2687_v27 = vsub.f32 %v2482_v54, %v2521_v20  ;;  %v149_v61 = vmul.f32 %v2671_v52, %v2671_v52 }
  0xbf   :  { %3356 = vst [vmem:[#allocation10_spill] sm:$0xff] %v2679_v51  ;;  %3357 = vst [vmem:[#allocation11_spill] sm:$0xff] %v2693_v50  ;;  %v2699_v26 = vsub.f32 %v2495_v59, %v2521_v20  ;;  %v2150_v59 = vld [vmem:[%s3321_s3 + $0xf0] sm:$0xff]  }
  0xc0   :  { %v162_v25 = vadd.f32 %v161_v5, %v131_v31  ;;  %v177_v44 = vadd.f32 %v176_v37, %v145_v34  ;;  %v150_v31 = vmul.f32 %v2679_v51, %v2679_v51  ;;  %v151_v54 = vmul.f32 %v2687_v27, %v2687_v27  ;;  %v2151_v20 = vld [vmem:[%s3321_s3 + $0x30] sm:$0xff]   ;;  %1993 = vmatprep.subr.bf16.mxu1 %v2150_v59  ;;  %v2153_v34 = vld [vmem:[%s3321_s3 + $0x68] sm:$0xff]  }
  0xc1   :  { %v153_v57 = vmul.f32 %v2699_v26, %v2699_v26  ;;  %v2154_v37 = vld [vmem:[%s3321_s3 + $0xe8] sm:$0xff]  }
  0xc2   :  { %v163_v33 = vadd.f32 %v162_v25, %v132_v35  ;;  %v178_v53 = vadd.f32 %v177_v44, %v146_v38  ;;  %v152_v35 = vmul.f32 %v2693_v50, %v2693_v50  ;;  %v2157_v38 = vld [vmem:[%s3321_s3 + $0x60] sm:$0xff]   ;;  %v2802_v59 = vld [vmem:[%s3322_s1 + $0x8] sm:$0xff] }
  0xc3   :  { %v2158_v44 = vld [vmem:[%s3321_s3 + $0xe0] sm:$0xff]  }
  0xc4   :  { %v164_v40 = vadd.f32 %v163_v33, %v133_v39  ;;  %v179_v18 = vadd.f32 %v178_v53, %v147_v42  ;;  %v2149_v39 = vld [vmem:[%s3321_s3 + $0x70] sm:$0xff]   ;;  %v2161_v42 = vld [vmem:[%s3321_s3 + $0x58] sm:$0xff]  }
  0xc5   :  { %v2152_v33 = vld [vmem:[%s3321_s3 + $0xb0] sm:$0xff]   ;;  %1971 = vmatprep.subr.bf16.mxu0 %v2149_v39  ;;  %v2162_v53 = vld [vmem:[%s3321_s3 + $0xd8] sm:$0xff]  }
  0xc6   :  { %v165_v49 = vadd.f32 %v164_v40, %v134_v43  ;;  %v180_v22 = vadd.f32 %v179_v18, %v148_v12  ;;  %1972 = vmatpush3.bf16.msra.mxu0 %v2151_v20  ;;  %1994 = vmatpush3.bf16.msra.mxu1 %v2152_v33  ;;  %v2155_v43 = vld [vmem:[%s3321_s3 + $0x28] sm:$0xff]   ;;  %v2165_v12 = vld [vmem:[%s3321_s3 + $0x50] sm:$0xff]  }
  0xc7   :  { %v2156_v40 = vld [vmem:[%s3321_s3 + $0xa8] sm:$0xff]   ;;  %1973 = vmatprep.subr.bf16.mxu0 %v2153_v34  ;;  %1995 = vmatprep.subr.bf16.mxu1 %v2154_v37  ;;  %v2166_v18 = vld [vmem:[%s3321_s3 + $0xd0] sm:$0xff]  }
  0xc8   :  { %v166_v55 = vadd.f32 %v165_v49, %v135_v47  ;;  %v181_v5 = vadd.f32 %v180_v22, %v149_v61  ;;  %v2159_v47 = vld [vmem:[%s3321_s3 + $0x20] sm:$0xff]   ;;  %v2169_v61 = vld [vmem:[%s3321_s3 + $0x48] sm:$0xff]  }
  0xc9   :  { %v2160_v49 = vld [vmem:[%s3321_s3 + $0xa0] sm:$0xff]   ;;  %v2170_v22 = vld [vmem:[%s3321_s3 + $0xc8] sm:$0xff]  }
  0xca   :  { %v167_v58 = vadd.f32 %v166_v55, %v136_v23  ;;  %v182_v17 = vadd.f32 %v181_v5, %v150_v31  ;;  %1974 = vmatpush3.bf16.msra.mxu0 %v2155_v43  ;;  %1996 = vmatpush3.bf16.msra.mxu1 %v2156_v40  ;;  %v2163_v23 = vld [vmem:[%s3321_s3 + $0x18] sm:$0xff]   ;;  %v2172_v31 = vld [vmem:[%s3321_s3 + $0x88] sm:$0xff]   ;;  %v2173_v5 = vld [vmem:[%s3321_s3 + $0x40] sm:$0xff]  }
  0xcb   :  { %1975 = vmatprep.subr.bf16.mxu0 %v2157_v38  ;;  %1997 = vmatprep.subr.bf16.mxu1 %v2158_v44  ;;  %v2164_v55 = vld [vmem:[%s3321_s3 + $0x98] sm:$0xff]   ;;  %v2807_v20 = vld [vmem:[%s3323_s2 + $0x8] sm:$0xff] }
  0xcc   :  { %v168_v63 = vadd.f32 %v167_v58, %v137_v46  ;;  %v183_v25 = vadd.f32 %v182_v17, %v151_v54  ;;  %v2167_v46 = vld [vmem:[%s3321_s3 + $0x10] sm:$0xff]   ;;  %v2174_v54 = vld [vmem:[%s3321_s3 + $0xc0] sm:$0xff]  }
  0xcd   :  { %v2168_v58 = vld [vmem:[%s3321_s3 + $0x90] sm:$0xff]   ;;  %v2175_v17 = vld [vmem:[%s3321_s3] sm:$0xff]  }
  0xce   :  { %169 = vadd.xlane.f32.xlu1 %v168_v63  ;;  %v184_v30 = vadd.f32 %v183_v25, %v152_v35  ;;  %1976 = vmatpush3.bf16.msra.mxu0 %v2159_v47  ;;  %v2171_v63 = vld [vmem:[%s3321_s3 + $0x8] sm:$0xff]   ;;  %v2176_v35 = vld [vmem:[%s3321_s3 + $0x80] sm:$0xff]   ;;  %v230_v25 = vlaneseq }
  0xcf   :  { %1998 = vmatpush3.bf16.msra.mxu1 %v2160_v49  ;;  %1977 = vmatprep.subr.bf16.mxu0 %v2161_v42 }
  0xd0   :  { %v185_v29 = vadd.f32 %v184_v30, %v153_v57  ;;  %1999 = vmatprep.subr.bf16.mxu1 %v2162_v53  ;;  %v231_v57 = vshrl.u32 %v230_v25, 7  ;;  %v2177_v30 = vld [vmem:[%s3321_s3 + $0x178] sm:$0xff]   ;;  %v2824_v53 = vld [vmem:[%s3322_s1] sm:$0xff] }
  0xd1   :  { %3363 = vst [vmem:[#allocation17_spill] sm:$0xff] %v2824_v53 }
  0xd2   :  { %186 = vadd.xlane.f32.xlu1 %v185_v29  ;;  %1978 = vmatpush3.bf16.msra.mxu0 %v2163_v23  ;;  %v2178_v29 = vld [vmem:[%s3321_s3 + $0x1f8] sm:$0xff]   ;;  %v2797_v39 = vsub.s32 6, %v231_v57  ;;  %v2817_v49 = vsub.s32 1, %v231_v57  ;;  %v2819_v42 = vsub.s32 3, %v231_v57  ;;  %v232_v23 = vsub.s32 0, %v231_v57 }
  0xd3   :  { %2000 = vmatpush3.bf16.msra.mxu1 %v2164_v55  ;;  %1979 = vmatprep.subr.bf16.mxu0 %v2165_v12  ;;  %v2826_v55 = vsub.s32 2, %v231_v57 }
  0xd4   :  { %2001 = vmatprep.subr.bf16.mxu1 %v2166_v18  ;;  %3358 = vst [vmem:[#allocation12_spill] sm:$0xff] %v2797_v39  ;;  %v2811_v33 = vrot.slane %v2802_v59, %v2797_v39  ;;  %v2815_v34 = vrot.slane %v2807_v20, %v2797_v39  ;;  %3361 = vst [vmem:[#allocation15_spill] sm:$0xff] %v2817_v49  ;;  %v2830_v18 = vsub.s32 5, %v231_v57 }
  0xd5   :  { %3362 = vst [vmem:[#allocation16_spill] sm:$0xff] %v2819_v42 }
  0xd6   :  { %1980 = vmatpush3.bf16.msra.mxu0 %v2167_v46  ;;  %3359 = vst [vmem:[#allocation13_spill] sm:$0xff] %v2811_v33  ;;  %3360 = vst [vmem:[#allocation14_spill] sm:$0xff] %v2815_v34  ;;  %v2832_v46 = vsub.s32 7, %v231_v57 }
  0xd7   :  { %2002 = vmatpush3.bf16.msra.mxu1 %v2168_v58  ;;  %1981 = vmatprep.subr.bf16.mxu0 %v2169_v61  ;;  %v237_v58 = vrot.slane %v2824_v53, %v2817_v49  ;;  %v245_v61 = vrot.slane %v2824_v53, %v2819_v42 }
  0xd8   :  { %2003 = vmatprep.subr.bf16.mxu1 %v2170_v22  ;;  %v2838_v22 = vsub.s32 4, %v231_v57  ;;  %v261_v57 = vrot.slane %v2824_v53, %v2832_v46 }
  0xda   :  { %1982 = vmatpush3.bf16.msra.mxu0 %v2171_v63 }
  0xdb   :  { %2004 = vmatpush3.bf16.msra.mxu1 %v2172_v31  ;;  %1983 = vmatprep.subr.bf16.mxu0 %v2173_v5  ;;  %v2845_v31 = vld [vmem:[%s3323_s2] sm:$0xff] }
  0xdc   :  { %2005 = vmatprep.subr.bf16.mxu1 %v2174_v54  ;;  %3364 = vst [vmem:[#allocation18_spill] sm:$0xff] %v2845_v31  ;;  %v233_v54 = vrot.slane %v2824_v53, %v232_v23 }
  0xde   :  { %1984 = vmatpush3.bf16.msra.mxu0 %v2175_v17  ;;  %v241_v17 = vrot.slane %v2824_v53, %v2826_v55 }
  0xdf   :  { %2006 = vmatpush3.bf16.msra.mxu1 %v2176_v35  ;;  %2013 = vmatprep.subr.bf16.mxu0 %v2177_v30 }
  0xe0   :  { %2035 = vmatprep.subr.bf16.mxu1 %v2178_v29  ;;  %v2865_v29 = vrot.slane %v2802_v59, %v232_v23 }
 0x157   :  { %v170_v37 = vpop.xlane.xlu1 %169 }
 0x158   :  { %v188_v43 = vmul.f32 0.00048828125, %v170_v37  ;;  %v361_v37 = vrot.slane %v2845_v31, %v2819_v42  ;;  %v377_v42 = vrot.slane %v2845_v31, %v2832_v46 }
 0x15a   :  { %v190_v40 = vadd.f32 1e-05, %v188_v43  ;;  %v349_v43 = vrot.slane %v2845_v31, %v232_v23 }
 0x15b   :  { %v187_v38 = vpop.xlane.xlu1 %186 }
 0x15c   :  { %2273 = vrsqrt.f32 %v190_v40  ;;  %v189_v44 = vmul.f32 0.00048828125, %v187_v38 }
 0x15e   :  { %v191_v47 = vadd.f32 1e-05, %v189_v44 }
 0x160   :  { %2275 = vrsqrt.f32 %v191_v47 }
 0x169   :  { %v2828_v12 = vpop.eup %2273 }
 0x16a   :  { %v195_v63 = vmul.f32 %v2828_v12, %v2519_v16  ;;  %v197_v5 = vmul.f32 %v2828_v12, %v2533_v0  ;;  %v194_v35 = vmul.f32 %v2828_v12, %v2515_v13  ;;  %v196_v25 = vmul.f32 %v2828_v12, %v2525_v21 }
 0x16b   :  { %v253_v16 = vrot.slane %v2824_v53, %v2830_v18  ;;  %v199_v0 = vmul.f32 %v2828_v12, %v2551_v4  ;;  %v201_v30 = vmul.f32 %v2828_v12, %v2571_v41  ;;  %v2869_v13 = vrot.slane %v2802_v59, %v2826_v55 }
 0x16c   :  { %v353_v21 = vrot.slane %v2845_v31, %v2817_v49  ;;  %v357_v4 = vrot.slane %v2845_v31, %v2826_v55  ;;  %v311_v40 = vmul.f32 %v237_v58, %v195_v63  ;;  %v313_v41 = vmul.f32 %v245_v61, %v197_v5 }
 0x16d   :  { %v202_v38 = vmul.f32 %v2828_v12, %v2581_v11  ;;  %v204_v44 = vmul.f32 %v2828_v12, %v2605_v60  ;;  %v310_v47 = vmul.f32 %v233_v54, %v194_v35  ;;  %v312_v3 = vmul.f32 %v241_v17, %v196_v25  ;;  %v2886_v14 = vpop.eup %2275 }
 0x16e   :  { %v369_v49 = vrot.slane %v2845_v31, %v2830_v18  ;;  %v315_v52 = vmul.f32 %v253_v16, %v199_v0  ;;  %v317_v39 = vmul.f32 %v261_v57, %v201_v30  ;;  %v211_v11 = vmul.f32 %v2886_v14, %v2547_v32 }
 0x16f   :  { %v318_v63 = vmul.f32 %v2865_v29, %v202_v38  ;;  %v320_v5 = vmul.f32 %v2869_v13, %v204_v44  ;;  %v213_v60 = vmul.f32 %v2886_v14, %v2577_v45  ;;  %v210_v35 = vmul.f32 %v2886_v14, %v2543_v2 }
 0x170   :  { %v212_v25 = vmul.f32 %v2886_v14, %v2563_v9  ;;  %v427_v31 = vadd.f32 %v353_v21, %v311_v40  ;;  %v429_v36 = vadd.f32 %v361_v37, %v313_v41  ;;  %v215_v0 = vmul.f32 %v2886_v14, %v2599_v56 }
 0x171   :  { %v217_v30 = vmul.f32 %v2886_v14, %v2623_v7  ;;  %v327_v38 = vmul.f32 %v237_v58, %v211_v11  ;;  %v329_v44 = vmul.f32 %v245_v61, %v213_v60  ;;  %v326_v32 = vmul.f32 %v233_v54, %v210_v35  ;;  %v2179_v61 = vld [vmem:[%s3321_s3 + $0x138] sm:$0xff]   ;;  %v3365_v35 = vld [vmem:[#allocation10_spill] sm:$0xff] }
 0x172   :  { %v328_v1 = vmul.f32 %v241_v17, %v212_v25  ;;  %v426_v8 = vadd.f32 %v349_v43, %v310_v47  ;;  %v428_v45 = vadd.f32 %v357_v4, %v312_v3  ;;  %v331_v53 = vmul.f32 %v253_v16, %v215_v0  ;;  %v2180_v3 = vld [vmem:[%s3321_s3 + $0x1b8] sm:$0xff]  }
 0x173   :  { %v333_v62 = vmul.f32 %v261_v57, %v217_v30  ;;  %v443_v2 = vadd.f32 %v353_v21, %v327_v38  ;;  %v445_v19 = vadd.f32 %v361_v37, %v329_v44  ;;  %v442_v34 = vadd.f32 %v349_v43, %v326_v32  ;;  %v3366_v38 = vld [vmem:[#allocation11_spill] sm:$0xff]  ;;  %v3367_v32 = vld [vmem:[#allocation13_spill] sm:$0xff] }
 0x174   :  { %v444_v9 = vadd.f32 %v357_v4, %v328_v1  ;;  %v431_v40 = vadd.f32 %v369_v49, %v315_v52  ;;  %v447_v41 = vadd.f32 %v369_v49, %v331_v53  ;;  %v381_v56 = vrot.slane %v2807_v20, %v232_v23  ;;  %v2182_v52 = vld [vmem:[%s3321_s3 + $0x1f0] sm:$0xff]   ;;  %v2185_v23 = vld [vmem:[%s3321_s3 + $0x168] sm:$0xff]   ;;  %v2190_v4 = vld [vmem:[%s3321_s3 + $0x1e0] sm:$0xff]  }
 0x175   :  { %v449_v33 = vadd.f32 %v377_v42, %v333_v62  ;;  %v459_v50 = vpack.c.bf16 %v443_v2, %v427_v31  ;;  %v461_v51 = vpack.c.bf16 %v445_v19, %v429_v36  ;;  %v458_v7 = vpack.c.bf16 %v442_v34, %v426_v8  ;;  %v2181_v8 = vld [vmem:[%s3321_s3 + $0x170] sm:$0xff]   ;;  %v2191_v2 = vld [vmem:[%s3321_s3 + $0x120] sm:$0xff]  }
 0x176   :  { %v460_v58 = vpack.c.bf16 %v444_v9, %v428_v45  ;;  %v433_v54 = vadd.f32 %v377_v42, %v317_v39  ;;  %v389_v1 = vrot.slane %v2807_v20, %v2826_v55  ;;  %v285_v62 = vrot.slane %v2802_v59, %v2830_v18  ;;  %v2183_v42 = vld [vmem:[%s3321_s3 + $0x130] sm:$0xff]   ;;  %v2186_v55 = vld [vmem:[%s3321_s3 + $0x1e8] sm:$0xff]   ;;  %v2192_v9 = vld [vmem:[%s3321_s3 + $0x1a0] sm:$0xff]  }
 0x177   :  { %v293_v36 = vrot.slane %v2802_v59, %v2832_v46  ;;  %1537 = vmatprep.mubr.bf16.mxu0 %v459_v50  ;;  %1578 = vmatprep.mubr.bf16.mxu1 %v461_v51  ;;  %v463_v19 = vpack.c.bf16 %v447_v41, %v431_v40  ;;  %v207_v39 = vmul.f32 %v2828_v12, %v2641_v6  ;;  %v2184_v6 = vld [vmem:[%s3321_s3 + $0x1b0] sm:$0xff]  }
 0x178   :  { %v401_v34 = vrot.slane %v2807_v20, %v2830_v18  ;;  %1538 = vmatmul.mubr.bf16.vlgmr.msra.gmra.mxu0 %v458_v7  ;;  %1579 = vmatmul.mubr.bf16.vlgmr.msra.gmra.mxu1 %v460_v58  ;;  %v465_v49 = vpack.c.bf16 %v449_v33, %v433_v54  ;;  %v218_v51 = vmul.f32 %v2886_v14, %v2635_v28  ;;  %v2193_v7 = vld [vmem:[%s3321_s3 + $0x158] sm:$0xff]   ;;  %v3368_v54 = vld [vmem:[#allocation14_spill] sm:$0xff] }
 0x179   :  { %v2927_v50 = vadd.f32 %v381_v56, %v318_v63  ;;  %2014 = vmatpush3.bf16.msra.mxu0 %v2179_v61  ;;  %2036 = vmatpush3.bf16.msra.mxu1 %v2180_v3  ;;  %v220_v53 = vmul.f32 %v2886_v14, %v2659_v15  ;;  %v209_v33 = vmul.f32 %v2828_v12, %v2665_v48  ;;  %v2194_v58 = vld [vmem:[%s3321_s3 + $0x1d8] sm:$0xff]  }
 0x17a   :  { %v281_v28 = vrot.slane %v2802_v59, %v2838_v22  ;;  %1619 = vmatprep.mubr.bf16.mxu0 %v463_v19  ;;  %1660 = vmatprep.mubr.bf16.mxu1 %v465_v49  ;;  %v334_v18 = vmul.f32 %v2865_v29, %v218_v51  ;;  %v2948_v31 = vadd.f32 %v389_v1, %v320_v5  ;;  %v2198_v49 = vld [vmem:[%s3321_s3 + $0x1d0] sm:$0xff]  }
 0x17b   :  { %v223_v15 = vmul.f32 %v2886_v14, %v2687_v27  ;;  %2015 = vmatprep.subr.bf16.mxu0 %v2181_v8  ;;  %2037 = vmatprep.subr.bf16.mxu1 %v2182_v52  ;;  %v336_v48 = vmul.f32 %v2869_v13, %v220_v53  ;;  %v206_v17 = vmul.f32 %v2828_v12, %v2629_v24  ;;  %v2187_v27 = vld [vmem:[%s3321_s3 + $0x128] sm:$0xff]   ;;  %v2195_v8 = vld [vmem:[%s3321_s3 + $0x118] sm:$0xff]  }
 0x17c   :  { %v208_v16 = vmul.f32 %v2828_v12, %v2653_v10  ;;  %v2957_v57 = vadd.f32 %v381_v56, %v334_v18  ;;  %v323_v21 = vmul.f32 %v285_v62, %v207_v39  ;;  %v225_v29 = vmul.f32 %v2886_v14, %v2699_v26  ;;  %v2188_v24 = vld [vmem:[%s3321_s3 + $0x1a8] sm:$0xff]   ;;  %v2189_v26 = vld [vmem:[%s3321_s3 + $0x160] sm:$0xff]   ;;  %v2196_v52 = vld [vmem:[%s3321_s3 + $0x198] sm:$0xff]  }
 0x17d   :  { %v339_v37 = vmul.f32 %v285_v62, %v223_v15  ;;  %2016 = vmatpush3.bf16.msra.mxu0 %v2183_v42  ;;  %2038 = vmatpush3.bf16.msra.mxu1 %v2184_v6  ;;  %v2967_v13 = vadd.f32 %v389_v1, %v336_v48  ;;  %v409_v10 = vrot.slane %v2807_v20, %v2832_v46  ;;  %v2199_v42 = vld [vmem:[%s3321_s3 + $0x110] sm:$0xff]   ;;  %v2201_v53 = vld [vmem:[%s3321_s3 + $0x148] sm:$0xff]   ;;  %v3371_v15 = vld [vmem:[#allocation17_spill] sm:$0xff] }
 0x17e   :  { %v397_v43 = vrot.slane %v2807_v20, %v2838_v22  ;;  %2017 = vmatprep.subr.bf16.mxu0 %v2185_v23  ;;  %2039 = vmatprep.subr.bf16.mxu1 %v2186_v55  ;;  %v466_v47 = vpack.c.bf16 %v2957_v57, %v2927_v50  ;;  %v2981_v63 = vadd.f32 %v401_v34, %v323_v21  ;;  %v2200_v6 = vld [vmem:[%s3321_s3 + $0x190] sm:$0xff]   ;;  %v3370_v55 = vld [vmem:[#allocation6_spill] sm:$0xff]  ;;  %v2249_v57 = vld [vmem:[%s3321_s3 + $0x368] sm:$0xff]  }
 0x17f   :  { %v2983_v5 = vadd.f32 %v401_v34, %v339_v37  ;;  %v468_v46 = vpack.c.bf16 %v2967_v13, %v2948_v31  ;;  %v325_v11 = vmul.f32 %v293_v36, %v209_v33  ;;  %v341_v60 = vmul.f32 %v293_v36, %v225_v29  ;;  %v2197_v34 = vld [vmem:[%s3321_s3 + $0x150] sm:$0xff]   ;;  %v2202_v33 = vld [vmem:[%s3321_s3 + $0x1c8] sm:$0xff]   ;;  %v3373_v21 = vld [vmem:[#allocation2_spill] sm:$0xff] }
 0x180   :  { %v222_v25 = vmul.f32 %v2886_v14, %v3365_v35  ;;  %v322_v30 = vmul.f32 %v281_v28, %v206_v17  ;;  %v224_v44 = vmul.f32 %v2886_v14, %v3366_v38  ;;  %v324_v45 = vmul.f32 %v3367_v32, %v208_v16  ;;  %v3372_v17 = vld [vmem:[#allocation8_spill] sm:$0xff]  ;;  %v3374_v29 = vld [vmem:[#allocation3_spill] sm:$0xff] }
 0x181   :  { %v471_v0 = vpack.c.bf16 %v2983_v5, %v2981_v63  ;;  %2018 = vmatpush3.bf16.msra.mxu0 %v2187_v27  ;;  %2040 = vmatpush3.bf16.msra.mxu1 %v2188_v24  ;;  %v3000_v40 = vadd.f32 %v409_v10, %v325_v11  ;;  %v3002_v41 = vadd.f32 %v409_v10, %v341_v60  ;;  %v3375_v24 = vld [vmem:[#allocation12_spill] sm:$0xff]  ;;  %v2204_v11 = vld [vmem:[%s3321_s3 + $0x188] sm:$0xff]   ;;  %v3377_v60 = vld [vmem:[#allocation5_spill] sm:$0xff] }
 0x182   :  { %v338_v56 = vmul.f32 %v281_v28, %v222_v25  ;;  %2019 = vmatprep.subr.bf16.mxu0 %v2189_v26  ;;  %2041 = vmatprep.subr.bf16.mxu1 %v2190_v4  ;;  %v3010_v61 = vadd.f32 %v397_v43, %v322_v30  ;;  %v340_v3 = vmul.f32 %v3367_v32, %v224_v44  ;;  %v3369_v28 = vld [vmem:[#allocation4_spill] sm:$0xff]  ;;  %v2203_v4 = vld [vmem:[%s3321_s3 + $0x108] sm:$0xff]   ;;  %v2206_v32 = vld [vmem:[%s3321_s3 + $0x1c0] sm:$0xff]  }
 0x183   :  { %v3014_v1 = vadd.f32 %v3368_v54, %v324_v45  ;;  %v473_v62 = vpack.c.bf16 %v3002_v41, %v3000_v40  ;;  %v214_v23 = vmul.f32 %v2886_v14, %v3369_v28  ;;  %v216_v18 = vmul.f32 %v2886_v14, %v3370_v55  ;;  %v3378_v25 = vld [vmem:[#allocation15_spill] sm:$0xff]  ;;  %v3379_v38 = vld [vmem:[#allocation16_spill] sm:$0xff]  ;;  %v2210_v28 = vld [vmem:[%s3321_s3 + $0x2f8] sm:$0xff]  }
 0x184   :  { %v3018_v36 = vadd.f32 %v397_v43, %v338_v56  ;;  %v3021_v19 = vadd.f32 %v3368_v54, %v340_v3  ;;  %v249_v48 = vrot.slane %v3371_v15, %v2838_v22  ;;  %v219_v16 = vmul.f32 %v2886_v14, %v3372_v17  ;;  %v3376_v43 = vld [vmem:[#allocation9_spill] sm:$0xff]  ;;  %v2248_v50 = vld [vmem:[%s3321_s3 + $0x3b0] sm:$0xff]   ;;  %v2250_v31 = vld [vmem:[%s3321_s3 + $0x3e8] sm:$0xff]  }
 0x185   :  { %2020 = vmatpush3.bf16.msra.mxu0 %v2191_v2  ;;  %2042 = vmatpush3.bf16.msra.mxu1 %v2192_v9  ;;  %v198_v37 = vmul.f32 %v2828_v12, %v3373_v21  ;;  %v200_v27 = vmul.f32 %v2828_v12, %v3374_v29  ;;  %v257_v10 = vrot.slane %v3371_v15, %v3375_v24  ;;  %v3380_v9 = vld [vmem:[#allocation7_spill] sm:$0xff]  ;;  %v2253_v63 = vld [vmem:[%s3321_s3 + $0x360] sm:$0xff]   ;;  %v2257_v40 = vld [vmem:[%s3321_s3 + $0x358] sm:$0xff]  }
 0x186   :  { %v470_v39 = vpack.c.bf16 %v3018_v36, %v3010_v61  ;;  %2021 = vmatprep.subr.bf16.mxu0 %v2193_v7  ;;  %2043 = vmatprep.subr.bf16.mxu1 %v2194_v58  ;;  %v472_v51 = vpack.c.bf16 %v3021_v19, %v3014_v1  ;;  %v221_v26 = vmul.f32 %v2886_v14, %v3376_v43  ;;  %v2205_v14 = vld [vmem:[%s3321_s3 + $0x140] sm:$0xff]   ;;  %v2251_v13 = vld [vmem:[%s3321_s3 + $0x328] sm:$0xff]   ;;  %v2258_v41 = vld [vmem:[%s3321_s3 + $0x3d8] sm:$0xff]  }
 0x187   :  { %v203_v35 = vmul.f32 %v2828_v12, %v3377_v60  ;;  %v269_v30 = vrot.slane %v2802_v59, %v3378_v25  ;;  %v277_v44 = vrot.slane %v2802_v59, %v3379_v38  ;;  %v330_v45 = vmul.f32 %v249_v48, %v214_v23  ;;  %v3381_v7 = vld [vmem:[#allocation18_spill] sm:$0xff]  ;;  %v2218_v60 = vld [vmem:[%s3321_s3 + $0x2e8] sm:$0xff]  }
 0x188   :  { %v332_v2 = vmul.f32 %v257_v10, %v216_v18  ;;  %v205_v56 = vmul.f32 %v2828_v12, %v3380_v9  ;;  %v365_v58 = vrot.slane %v3381_v7, %v2838_v22  ;;  %v314_v59 = vmul.f32 %v249_v48, %v198_v37  ;;  %v2208_v12 = vld [vmem:[%s3321_s3 + $0x180] sm:$0xff]   ;;  %v2212_v37 = vld [vmem:[%s3321_s3 + $0x2b8] sm:$0xff]  }
 0x189   :  { %2022 = vmatpush3.bf16.msra.mxu0 %v2195_v8  ;;  %2044 = vmatpush3.bf16.msra.mxu1 %v2196_v52  ;;  %v335_v3 = vmul.f32 %v269_v30, %v219_v16  ;;  %v316_v54 = vmul.f32 %v257_v10, %v200_v27  ;;  %v373_v8 = vrot.slane %v3381_v7, %v3375_v24  ;;  %v2213_v24 = vld [vmem:[%s3321_s3 + $0x270] sm:$0xff]   ;;  %v2228_v9 = vld [vmem:[%s3321_s3 + $0x298] sm:$0xff]   ;;  %v2254_v5 = vld [vmem:[%s3321_s3 + $0x3e0] sm:$0xff]  }
 0x18a   :  { %2023 = vmatprep.subr.bf16.mxu0 %v2197_v34  ;;  %2045 = vmatprep.subr.bf16.mxu1 %v2198_v49  ;;  %v337_v52 = vmul.f32 %v277_v44, %v221_v26  ;;  %v2207_v34 = vld [vmem:[%s3321_s3 + $0x100] sm:$0xff]   ;;  %v319_v49 = vmul.f32 %v269_v30, %v203_v35  ;;  %v385_v22 = vrot.slane %v2807_v20, %v3378_v25  ;;  %v2214_v10 = vld [vmem:[%s3321_s3 + $0x2f0] sm:$0xff]   ;;  %v2219_v35 = vld [vmem:[%s3321_s3 + $0x228] sm:$0xff]  }
 0x18b   :  { %v321_v23 = vmul.f32 %v277_v44, %v205_v56  ;;  %v430_v18 = vadd.f32 %v365_v58, %v314_v59  ;;  %v432_v15 = vadd.f32 %v373_v8, %v316_v54  ;;  %v2215_v26 = vld [vmem:[%s3321_s3 + $0x230] sm:$0xff]   ;;  %v2220_v25 = vld [vmem:[%s3321_s3 + $0x2a8] sm:$0xff]   ;;  %v2221_v30 = vld [vmem:[%s3321_s3 + $0x260] sm:$0xff]  }
 0x18c   :  { %v451_v55 = vadd.f32 %v385_v22, %v335_v3  ;;  %v435_v17 = vadd.f32 %v385_v22, %v319_v49  ;;  %v2223_v44 = vld [vmem:[%s3321_s3 + $0x220] sm:$0xff]   ;;  %v2229_v56 = vld [vmem:[%s3321_s3 + $0x250] sm:$0xff]   ;;  %v2233_v59 = vld [vmem:[%s3321_s3 + $0x248] sm:$0xff]  }
 0x18d   :  { %2024 = vmatpush3.bf16.msra.mxu0 %v2199_v42  ;;  %2046 = vmatpush3.bf16.msra.mxu1 %v2200_v6  ;;  %v393_v42 = vrot.slane %v2807_v20, %v3379_v38  ;;  %v446_v6 = vadd.f32 %v365_v58, %v330_v45  ;;  %v2211_v20 = vld [vmem:[%s3321_s3 + $0x238] sm:$0xff]   ;;  %v2222_v38 = vld [vmem:[%s3321_s3 + $0x2e0] sm:$0xff]   ;;  %v2230_v7 = vld [vmem:[%s3321_s3 + $0x2d0] sm:$0xff]  }
 0x18e   :  { %2025 = vmatprep.subr.bf16.mxu0 %v2201_v53  ;;  %2047 = vmatprep.subr.bf16.mxu1 %v2202_v33  ;;  %v448_v53 = vadd.f32 %v373_v8, %v332_v2  ;;  %v2209_v33 = vld [vmem:[%s3321_s3 + $0x278] sm:$0xff]   ;;  %v467_v27 = vpack.c.bf16 %v451_v55, %v435_v17  ;;  %v2231_v58 = vld [vmem:[%s3321_s3 + $0x210] sm:$0xff]   ;;  %v2234_v54 = vld [vmem:[%s3321_s3 + $0x2c8] sm:$0xff]  }
 0x18f   :  { %v453_v48 = vadd.f32 %v393_v42, %v337_v52  ;;  %v462_v16 = vpack.c.bf16 %v446_v6, %v430_v18  ;;  %v437_v29 = vadd.f32 %v393_v42, %v321_v23  ;;  %v2226_v45 = vld [vmem:[%s3321_s3 + $0x2d8] sm:$0xff]   ;;  %v2232_v3 = vld [vmem:[%s3321_s3 + $0x290] sm:$0xff]   ;;  %v2235_v8 = vld [vmem:[%s3321_s3 + $0x208] sm:$0xff]  }
 0x190   :  { %v464_v21 = vpack.c.bf16 %v448_v53, %v432_v15  ;;  %v2227_v2 = vld [vmem:[%s3321_s3 + $0x218] sm:$0xff]   ;;  %v2236_v52 = vld [vmem:[%s3321_s3 + $0x288] sm:$0xff]   ;;  %v2239_v49 = vld [vmem:[%s3321_s3 + $0x200] sm:$0xff]  }
 0x191   :  { %2026 = vmatpush3.bf16.msra.mxu0 %v2203_v4  ;;  %2048 = vmatpush3.bf16.msra.mxu1 %v2204_v11  ;;  %v469_v43 = vpack.c.bf16 %v453_v48, %v437_v29  ;;  %v2216_v4 = vld [vmem:[%s3321_s3 + $0x2b0] sm:$0xff]   ;;  %v2217_v11 = vld [vmem:[%s3321_s3 + $0x268] sm:$0xff]   ;;  %v2240_v22 = vld [vmem:[%s3321_s3 + $0x280] sm:$0xff]  }
 0x192   :  { %2027 = vmatprep.subr.bf16.mxu0 %v2205_v14  ;;  %2049 = vmatprep.subr.bf16.mxu1 %v2206_v32  ;;  %v2224_v14 = vld [vmem:[%s3321_s3 + $0x2a0] sm:$0xff]   ;;  %v2225_v32 = vld [vmem:[%s3321_s3 + $0x258] sm:$0xff]   ;;  %v2246_v23 = vld [vmem:[%s3321_s3 + $0x3f0] sm:$0xff]  }
 0x193   :  { %v2241_v42 = vld [vmem:[%s3321_s3 + $0x378] sm:$0xff]   ;;  %v2247_v55 = vld [vmem:[%s3321_s3 + $0x330] sm:$0xff]   ;;  %v2268_v29 = vld [vmem:[%s3321_s3 + $0x388] sm:$0xff]  }
 0x194   :  { %v2242_v6 = vld [vmem:[%s3321_s3 + $0x3f8] sm:$0xff]   ;;  %v2261_v15 = vld [vmem:[%s3321_s3 + $0x350] sm:$0xff]   ;;  %v1840_v1 = vld [vmem:[%s3324_s4] ss:$0 sm:$0xff] }
 0x195   :  { %2028 = vmatpush3.bf16.msra.mxu0 %v2207_v34  ;;  %2050 = vmatpush3.bf16.msra.mxu1 %v2208_v12  ;;  %v2237_v34 = vld [vmem:[%s3321_s3 + $0x240] sm:$0xff]   ;;  %v2243_v53 = vld [vmem:[%s3321_s3 + $0x338] sm:$0xff]   ;;  %v2262_v48 = vld [vmem:[%s3321_s3 + $0x3d0] sm:$0xff]  }
 0x196   :  { %2057 = vmatprep.subr.bf16.mxu0 %v2209_v33  ;;  %2079 = vmatprep.subr.bf16.mxu1 %v2210_v28  ;;  %v2238_v12 = vld [vmem:[%s3321_s3 + $0x2c0] sm:$0xff]   ;;  %v2244_v33 = vld [vmem:[%s3321_s3 + $0x3b8] sm:$0xff]   ;;  %v2245_v28 = vld [vmem:[%s3321_s3 + $0x370] sm:$0xff]  }
 0x197   :  { %v2260_v18 = vld [vmem:[%s3321_s3 + $0x398] sm:$0xff]   ;;  %v2264_v17 = vld [vmem:[%s3321_s3 + $0x390] sm:$0xff]  }
 0x198   :  { %1620 = vmatmul.mubr.bf16.vlgmr.msra.gmra.mxu0 %v462_v16  ;;  %1661 = vmatmul.mubr.bf16.vlgmr.msra.gmra.mxu1 %v464_v21  ;;  %v2265_v16 = vld [vmem:[%s3321_s3 + $0x348] sm:$0xff]  }
 0x199   :  { %2058 = vmatpush3.bf16.msra.mxu0 %v2211_v20  ;;  %1701 = vmatprep.mubr.bf16.mxu0 %v467_v27  ;;  %v2263_v20 = vld [vmem:[%s3321_s3 + $0x310] sm:$0xff]   ;;  %v2266_v21 = vld [vmem:[%s3321_s3 + $0x3c8] sm:$0xff]   ;;  %v2269_v27 = vld [vmem:[%s3321_s3 + $0x340] sm:$0xff]  }
 0x19a   :  { %2080 = vmatpush3.bf16.msra.mxu1 %v2212_v37  ;;  %1742 = vmatprep.mubr.bf16.mxu1 %v469_v43  ;;  %v2267_v37 = vld [vmem:[%s3321_s3 + $0x308] sm:$0xff]   ;;  %v2272_v43 = vld [vmem:[%s3321_s3 + $0x380] sm:$0xff]  }
 0x19b   :  { %2059 = vmatprep.subr.bf16.mxu0 %v2213_v24  ;;  %2081 = vmatprep.subr.bf16.mxu1 %v2214_v10  ;;  %v2270_v24 = vld [vmem:[%s3321_s3 + $0x3c0] sm:$0xff]  }
 0x19c   :  { %v2271_v10 = vld [vmem:[%s3321_s3 + $0x300] sm:$0xff]  }
 0x19d   :  { %2060 = vmatpush3.bf16.msra.mxu0 %v2215_v26 }
 0x19e   :  { %2082 = vmatpush3.bf16.msra.mxu1 %v2216_v4  ;;  %2061 = vmatprep.subr.bf16.mxu0 %v2217_v11 }
 0x19f   :  { %2083 = vmatprep.subr.bf16.mxu1 %v2218_v60 }
 0x1a1   :  { %2062 = vmatpush3.bf16.msra.mxu0 %v2219_v35 }
 0x1a2   :  { %2084 = vmatpush3.bf16.msra.mxu1 %v2220_v25  ;;  %2063 = vmatprep.subr.bf16.mxu0 %v2221_v30 }
 0x1a3   :  { %2085 = vmatprep.subr.bf16.mxu1 %v2222_v38 }
 0x1a5   :  { %2064 = vmatpush3.bf16.msra.mxu0 %v2223_v44 }
 0x1a6   :  { %2086 = vmatpush3.bf16.msra.mxu1 %v2224_v14  ;;  %2065 = vmatprep.subr.bf16.mxu0 %v2225_v32 }
 0x1a7   :  { %2087 = vmatprep.subr.bf16.mxu1 %v2226_v45 }
 0x1a9   :  { %2066 = vmatpush3.bf16.msra.mxu0 %v2227_v2 }
 0x1aa   :  { %2088 = vmatpush3.bf16.msra.mxu1 %v2228_v9  ;;  %2067 = vmatprep.subr.bf16.mxu0 %v2229_v56 }
 0x1ab   :  { %2089 = vmatprep.subr.bf16.mxu1 %v2230_v7 }
 0x1ad   :  { %2068 = vmatpush3.bf16.msra.mxu0 %v2231_v58 }
 0x1ae   :  { %2090 = vmatpush3.bf16.msra.mxu1 %v2232_v3  ;;  %2069 = vmatprep.subr.bf16.mxu0 %v2233_v59 }
 0x1af   :  { %2091 = vmatprep.subr.bf16.mxu1 %v2234_v54 }
 0x1b1   :  { %2070 = vmatpush3.bf16.msra.mxu0 %v2235_v8 }
 0x1b2   :  { %2092 = vmatpush3.bf16.msra.mxu1 %v2236_v52  ;;  %2071 = vmatprep.subr.bf16.mxu0 %v2237_v34 }
 0x1b3   :  { %2093 = vmatprep.subr.bf16.mxu1 %v2238_v12 }
 0x1b5   :  { %2072 = vmatpush3.bf16.msra.mxu0 %v2239_v49 }
 0x1b6   :  { %2094 = vmatpush3.bf16.msra.mxu1 %v2240_v22  ;;  %2101 = vmatprep.subr.bf16.mxu0 %v2241_v42 }
 0x1b7   :  { %2123 = vmatprep.subr.bf16.mxu1 %v2242_v6 }
 0x1b8   :  { %1702 = vmatmul.mubr.bf16.vlgmr.msra.gmra.mxu0 %v466_v47  ;;  %v2252_v47 = vld [vmem:[%s3321_s3 + $0x3a8] sm:$0xff]  }
 0x1b9   :  { %1743 = vmatmul.mubr.bf16.vlgmr.msra.gmra.mxu1 %v468_v46  ;;  %2102 = vmatpush3.bf16.msra.mxu0 %v2243_v53  ;;  %v2255_v46 = vld [vmem:[%s3321_s3 + $0x320] sm:$0xff]  }
 0x1ba   :  { %1783 = vmatprep.mubr.bf16.mxu0 %v471_v0  ;;  %2124 = vmatpush3.bf16.msra.mxu1 %v2244_v33  ;;  %v2256_v0 = vld [vmem:[%s3321_s3 + $0x3a0] sm:$0xff]  }
 0x1bb   :  { %1824 = vmatprep.mubr.bf16.mxu1 %v473_v62  ;;  %2103 = vmatprep.subr.bf16.mxu0 %v2245_v28  ;;  %v2259_v62 = vld [vmem:[%s3321_s3 + $0x318] sm:$0xff]  }
 0x1bc   :  { %2125 = vmatprep.subr.bf16.mxu1 %v2246_v23 }
 0x1bd   :  { %2104 = vmatpush3.bf16.msra.mxu0 %v2247_v55 }
 0x1be   :  { %2126 = vmatpush3.bf16.msra.mxu1 %v2248_v50  ;;  %2105 = vmatprep.subr.bf16.mxu0 %v2249_v57 }
 0x1bf   :  { %2127 = vmatprep.subr.bf16.mxu1 %v2250_v31 }
 0x1c1   :  { %2106 = vmatpush3.bf16.msra.mxu0 %v2251_v13 }
 0x1c2   :  { %2128 = vmatpush3.bf16.msra.mxu1 %v2252_v47  ;;  %2107 = vmatprep.subr.bf16.mxu0 %v2253_v63 }
 0x1c3   :  { %2129 = vmatprep.subr.bf16.mxu1 %v2254_v5 }
 0x1c5   :  { %2108 = vmatpush3.bf16.msra.mxu0 %v2255_v46 }
 0x1c6   :  { %2130 = vmatpush3.bf16.msra.mxu1 %v2256_v0  ;;  %2109 = vmatprep.subr.bf16.mxu0 %v2257_v40 }
 0x1c7   :  { %2131 = vmatprep.subr.bf16.mxu1 %v2258_v41 }
 0x1c9   :  { %2110 = vmatpush3.bf16.msra.mxu0 %v2259_v62 }
 0x1ca   :  { %2132 = vmatpush3.bf16.msra.mxu1 %v2260_v18  ;;  %2111 = vmatprep.subr.bf16.mxu0 %v2261_v15 }
 0x1cb   :  { %2133 = vmatprep.subr.bf16.mxu1 %v2262_v48 }
 0x1cd   :  { %2112 = vmatpush3.bf16.msra.mxu0 %v2263_v20 }
 0x1ce   :  { %2134 = vmatpush3.bf16.msra.mxu1 %v2264_v17  ;;  %2113 = vmatprep.subr.bf16.mxu0 %v2265_v16 }
 0x1cf   :  { %2135 = vmatprep.subr.bf16.mxu1 %v2266_v21 }
 0x1d1   :  { %2114 = vmatpush3.bf16.msra.mxu0 %v2267_v37 }
 0x1d2   :  { %2136 = vmatpush3.bf16.msra.mxu1 %v2268_v29  ;;  %2115 = vmatprep.subr.bf16.mxu0 %v2269_v27 }
 0x1d3   :  { %2137 = vmatprep.subr.bf16.mxu1 %v2270_v24 }
 0x1d5   :  { %2116 = vmatpush3.bf16.msra.mxu0 %v2271_v10 }
 0x1d6   :  { %2138 = vmatpush3.bf16.msra.mxu1 %v2272_v43 }
 0x1d8   :  { %1784 = vmatmul.mubr.bf16.vlgmr.msra.gmra.mxu0 %v470_v39 }
 0x1d9   :  { %1825 = vmatmul.mubr.bf16.vlgmr.msra.gmra.mxu1 %v472_v51 }
 0x238   :  { %v1985_v26 = vpop.f32.mrf.mxu0  ;;  %v2007_v4 = vpop.f32.mrf.mxu1 }
 0x23a   :  { %v1986_v11 = vpop.f32.mrf.mxu0  ;;  %v2008_v60 = vpop.f32.mrf.mxu1 }
 0x23b   :  { %v1987_v36 = vadd.f32 %v1986_v11, %v1985_v26  ;;  %v2009_v3 = vadd.f32 %v2008_v60, %v2007_v4 }
 0x23c   :  { %v1988_v35 = vpop.f32.mrf.mxu0  ;;  %v2010_v25 = vpop.f32.mrf.mxu1 }
 0x23d   :  { %v1540_v51 = vadd.f32 %v1987_v36, %v1840_v1 }
 0x23e   :  { %v1989_v30 = vpop.f32.mrf.mxu0  ;;  %v2011_v44 = vpop.f32.mrf.mxu1 }
 0x23f   :  { %v1990_v56 = vadd.f32 %v1989_v30, %v1988_v35  ;;  %v1581_v54 = vadd.f32 %v2009_v3, %v1540_v51  ;;  %v2012_v12 = vadd.f32 %v2011_v44, %v2010_v25 }
 0x241   :  { %v1543_v8 = vadd.f32 %v1990_v56, %v1840_v1 }
 0x243   :  { %v1584_v42 = vadd.f32 %v2012_v12, %v1543_v8 }
 0x258   :  { %v2029_v38 = vpop.f32.mrf.mxu0  ;;  %v2051_v14 = vpop.f32.mrf.mxu1 }
 0x25a   :  { %v2030_v32 = vpop.f32.mrf.mxu0  ;;  %v2052_v45 = vpop.f32.mrf.mxu1 }
 0x25b   :  { %v2031_v59 = vadd.f32 %v2030_v32, %v2029_v38  ;;  %v2053_v6 = vadd.f32 %v2052_v45, %v2051_v14 }
 0x25c   :  { %v2032_v2 = vpop.f32.mrf.mxu0  ;;  %v2054_v9 = vpop.f32.mrf.mxu1 }
 0x25d   :  { %v1622_v49 = vadd.f32 %v2031_v59, %v1581_v54 }
 0x25e   :  { %v2033_v61 = vpop.f32.mrf.mxu0  ;;  %v2055_v39 = vpop.f32.mrf.mxu1 }
 0x25f   :  { %v2034_v22 = vadd.f32 %v2033_v61, %v2032_v2  ;;  %v1663_v23 = vadd.f32 %v2053_v6, %v1622_v49  ;;  %v2056_v50 = vadd.f32 %v2055_v39, %v2054_v9 }
 0x261   :  { %v1625_v55 = vadd.f32 %v2034_v22, %v1584_v42 }
 0x263   :  { %v1666_v63 = vadd.f32 %v2056_v50, %v1625_v55 }
 0x278   :  { %v2073_v19 = vpop.f32.mrf.mxu0 }
 0x279   :  { %v2095_v7 = vpop.f32.mrf.mxu1 }
 0x27a   :  { %v2074_v58 = vpop.f32.mrf.mxu0 }
 0x27b   :  { %v2096_v52 = vpop.f32.mrf.mxu1  ;;  %v2075_v53 = vadd.f32 %v2074_v58, %v2073_v19 }
 0x27c   :  { %v2076_v34 = vpop.f32.mrf.mxu0  ;;  %v2097_v5 = vadd.f32 %v2096_v52, %v2095_v7 }
 0x27d   :  { %v2098_v33 = vpop.f32.mrf.mxu1  ;;  %v1704_v57 = vadd.f32 %v2075_v53, %v1663_v23 }
 0x27e   :  { %v2077_v28 = vpop.f32.mrf.mxu0 }
 0x27f   :  { %v2078_v31 = vadd.f32 %v2077_v28, %v2076_v34  ;;  %v2099_v13 = vpop.f32.mrf.mxu1  ;;  %v1745_v40 = vadd.f32 %v2097_v5, %v1704_v57 }
 0x280   :  { %v2100_v48 = vadd.f32 %v2099_v13, %v2098_v33 }
 0x281   :  { %v1707_v41 = vadd.f32 %v2078_v31, %v1666_v63 }
 0x283   :  { %v1748_v37 = vadd.f32 %v2100_v48, %v1707_v41 }
 0x298   :  { %v2117_v47 = vpop.f32.mrf.mxu0 }
 0x299   :  { %v2139_v46 = vpop.f32.mrf.mxu1 }
 0x29a   :  { %v2118_v0 = vpop.f32.mrf.mxu0 }
 0x29b   :  { %v2119_v62 = vadd.f32 %v2118_v0, %v2117_v47  ;;  %v2140_v18 = vpop.f32.mrf.mxu1 }
 0x29c   :  { %v2120_v15 = vpop.f32.mrf.mxu0  ;;  %v2141_v17 = vadd.f32 %v2140_v18, %v2139_v46 }
 0x29d   :  { %v1786_v20 = vadd.f32 %v2119_v62, %v1745_v40  ;;  %v2142_v16 = vpop.f32.mrf.mxu1 }
 0x29e   :  { %v2121_v21 = vpop.f32.mrf.mxu0 }
 0x29f   :  { %v1827_v29 = vadd.f32 %v2141_v17, %v1786_v20  ;;  %v2122_v27 = vadd.f32 %v2121_v21, %v2120_v15  ;;  %v2143_v24 = vpop.f32.mrf.mxu1 }
 0x2a0   :  { %v2144_v43 = vadd.f32 %v2143_v24, %v2142_v16 }
 0x2a1   :  { %1834 = vst.msk [vmem:[%s3325_s5] sm:$0xff] %vm1833_vm0, %v1827_v29  ;;  %v1789_v10 = vadd.f32 %v2122_v27, %v1748_v37 }
 0x2a3   :  { %v1830_v26 = vadd.f32 %v2144_v43, %v1789_v10 }
 0x2a5   :  { %1835 = vst.msk [vmem:[%s3325_s5 + $0x8] sm:$0xff] %vm1833_vm0, %v1830_v26 }

// kernel: forward.5
= control target key start
LH: loop header
LB: loop body
LE: loop exit
PB: predicated region body
PF: predicated region fallthrough
CT: control target
= control target key end

     0   :  { %v155_v1 = vmov 0   ;;  %vm78_vm0 = vcmask 523264   ;;  %v28_v12 = vlaneseq  ;;  %s221_s1 = inlined_call_operand.vmem [shape: bf16[64,256], index: 1, kind: input, shape index: {}]   ;;  %s222_s0 = inlined_call_operand.vmem [shape: f32[16,64], index: 0, kind: input, shape index: {}]   ;;  %s223_s2 = inlined_call_operand.vmem [shape: f32[1,256], index: 2, kind: input, shape index: {}]   ;;  %s224_s3 = inlined_call_operand.vmem [shape: f32[16,256], index: 3, kind: output, shape index: {}]  }
   0x1   :  { %v143_v0 = vld [vmem:[%s221_s1 + $0x34] ss:$8 sps:$4 sm:$0xff]   ;;  %114 = vmatprep.mubr.bf16.mxu0 %v155_v1  ;;  %v145_v2 = vld [vmem:[%s221_s1 + $0x30] ss:$8 sps:$4 sm:$0xff]   ;;  %v146_v3 = vld [vmem:[%s221_s1 + $0x24] ss:$8 sps:$4 sm:$0xff]  }
   0x2   :  { %90 = vmatprep.subr.bf16.mxu0 %v143_v0  ;;  %v148_v4 = vld [vmem:[%s221_s1 + $0x20] ss:$8 sps:$4 sm:$0xff]   ;;  %v149_v5 = vld [vmem:[%s221_s1 + $0x14] ss:$8 sps:$4 sm:$0xff]   ;;  %v151_v6 = vld [vmem:[%s221_s1 + $0x10] ss:$8 sps:$4 sm:$0xff]  }
   0x3   :  { %91 = vmatpush1.bf16.msra.mxu0 %v145_v2  ;;  %v152_v7 = vld [vmem:[%s221_s1 + $0x4] ss:$8 sps:$4 sm:$0xff]   ;;  %v154_v8 = vld [vmem:[%s221_s1] ss:$8 sps:$4 sm:$0xff]   ;;  %v29_v13 = vshrl.u32 %v28_v12, 7 }
   0x4   :  { %92 = vmatprep.subr.bf16.mxu0 %v146_v3  ;;  %v15_v9 = vld [vmem:[%s222_s0] sm:$0xff]  ;;  %v16_v10 = vld [vmem:[%s222_s0 + $0x8] sm:$0xff] }
   0x5   :  { %v17_v11 = vpack.c.bf16 %v16_v10, %v15_v9  ;;  %v30_v14 = vsub.s32 0, %v29_v13  ;;  %v26_v15 = vld [vmem:[%s223_s2] sm:$0x3]  ;;  %v34_v16 = vsub.s32 1, %v29_v13 }
   0x7   :  { %93 = vmatpush1.bf16.msra.mxu0 %v148_v4  ;;  %v31_v17 = vrot.slane %v26_v15, %v30_v14  ;;  %v35_v18 = vrot.slane %v26_v15, %v34_v16 }
   0x8   :  { %94 = vmatprep.subr.bf16.mxu0 %v149_v5 }
   0xb   :  { %95 = vmatpush1.bf16.msra.mxu0 %v151_v6 }
   0xc   :  { %96 = vmatprep.subr.bf16.mxu0 %v152_v7 }
   0xf   :  { %97 = vmatpush1.bf16.msra.mxu0 %v154_v8 }
  0x12   :  { %141 = vmatmul.mubr.msk.bf16.vlgmr.msra.gmra.mxu0 %vm78_vm0, %v17_v11 }
  0xd2   :  { %v116_v19 = vpop.f32.mrf.mxu0 }
  0xd3   :  { %v117_v20 = vadd.f32 %v116_v19, %v31_v17 }
  0xd4   :  { %v118_v21 = vpop.f32.mrf.mxu0 }
  0xd5   :  { %125 = vst [vmem:[%s224_s3] sm:$0xff] %v117_v20  ;;  %v119_v22 = vadd.f32 %v118_v21, %v35_v18 }
  0xd6   :  { %v120_v23 = vpop.f32.mrf.mxu0 }
  0xd7   :  { %126 = vst [vmem:[%s224_s3 + $0x8] sm:$0xff] %v119_v22  ;;  %v121_v24 = vadd.f32 %v120_v23, %v31_v17 }
  0xd8   :  { %v122_v25 = vpop.f32.mrf.mxu0 }
  0xd9   :  { %127 = vst [vmem:[%s224_s3 + $0x10] sm:$0xff] %v121_v24  ;;  %v123_v26 = vadd.f32 %v122_v25, %v35_v18 }
  0xdb   :  { %128 = vst [vmem:[%s224_s3 + $0x18] sm:$0xff] %v123_v26 }

</bundles_post_ra>
